<compile_context>
chip_gen: v6e
topology: v6e:2x2x1
jax: 0.10.0
libtpu: 0.0.40
codegen_flags: <defaults>
</compile_context>

<pallas_src>
import numpy as np
import jax
import jax.numpy as jnp
from jax.experimental import pallas as pl
from jax.experimental.pallas import tpu as pltpu

# ---------------------------------------------------------------- config
B, T = 2, 8
VOCAB = 32
EMBED = 32          # question embedding dim
IMAGE_DIM = 64      # incoming image feature dim
IMAGE_EMBED = 128   # image embedding dim (== RNN_OUT for the elementwise mul)
HIDDEN = 32         # LSTM hidden dim
NUM_LAYERS = 2
RNN_OUT = 128       # == IMAGE_EMBED
OUT_DIM = 32
G = 4 * HIDDEN      # gates per layer = 128
LANES = 128

# -------- packed weight slab layout (row offsets, every block 128 lanes, f32)
_LAYOUT = [
    ("W_IMG",  IMAGE_DIM),               # (64,128)  image_embed weight (in,out)
    ("B_IMG",  8),                       # row 0 valid
    ("W_EMB",  VOCAB),                   # (32,128)  cols 0:EMBED valid, rest 0
    ("B_EMB",  8),
    ("W_IH0",  EMBED),                   # (32,128)  LSTM L0 input projection
    ("B0",     8),                       # b_ih0 + b_hh0
    ("W_RECL", 2 * HIDDEN),              # (64,128)  [whh0.T ; 0]      -> gates0
    ("W_RECR", 2 * HIDDEN),              # (64,128)  [wih1.T ; whh1.T] -> gates1
    ("B1",     8),                       # b_ih1 + b_hh1
    ("W_FC",   NUM_LAYERS * 2 * HIDDEN), # (128,128)
    ("B_FC",   8),
    ("W_MLP1", RNN_OUT),                 # (128,128) cols 0:OUT_DIM valid
    ("B_MLP1", 8),
    ("W_MLP2", OUT_DIM),                 # (32,128)  cols 0:OUT_DIM valid
    ("B_MLP2", 8),
]
OFF = {}
_r = 0
for _name, _n in _LAYOUT:
    OFF[_name] = _r
    _r += _n
SLAB_ROWS = _r                           # 600 rows (multiple of 8), ~300 KiB

_VMEM = pl.BlockSpec(memory_space=pltpu.MemorySpace.VMEM)


# ---------------------------------------------------------------- fused kernel
def deeper_lstm_kernel(img_ref, q_ref, w_ref, out_ref):
    f32 = jnp.float32
    H = HIDDEN

    def W(name, nrows):               # static, sublane-aligned slab slice
        o = OFF[name]
        return w_ref[o:o + nrows, :]

    def Brow(name):                   # single bias row (1, 128)
        o = OFF[name]
        return w_ref[o:o + 1, :]

    # ---- image branch: global-L2 normalize (rsqrt), Linear + Tanh ---------
    img = img_ref[...]                                          # (B, IMAGE_DIM)
    inv_norm = jax.lax.rsqrt(jnp.maximum(jnp.sum(img * img), 1e-24))
    img_features = jnp.tanh(
        jnp.dot(img * inv_norm, W("W_IMG", IMAGE_DIM),
                preferred_element_type=f32) + Brow("B_IMG"))    # (B, 128)

    # ---- question embedding (batch-major, one matmul) ----------------------
    # TODO(synk): Dropout(p=0.5) omitted (inference / eval mode => identity).
    q2 = q_ref[...].reshape(B * T, VOCAB)                       # (B*T, V)
    q_emb = jnp.tanh(
        jnp.dot(q2, W("W_EMB", VOCAB), preferred_element_type=f32)
        + Brow("B_EMB"))                                        # padded lanes -> 0
    q_emb = q_emb[:, :EMBED]                                    # (B*T, E)

    # layer-0 input projection hoisted out of the recurrence (b0 folded in)
    x0 = (jnp.dot(q_emb, W("W_IH0", EMBED), preferred_element_type=f32)
          + Brow("B0")).reshape(B, T, G)                        # (B, T, 4H)

    # ---- 2-layer LSTM, layers software-pipelined ---------------------------
    # PyTorch gate order [i, f, g, o].  Combined recurrent matrix:
    #   [h0|h1] @ [[whh0, wih1], [0, whh1]]  -> [gates0_rec | gates1_pre]
    w_rec = jnp.concatenate([W("W_RECL", 2 * H), W("W_RECR", 2 * H)],
                            axis=1)                             # (2H, 2G=256)
    b1 = Brow("B1")

    # single-tanh gate nonlinearity: act(x) = tanh(x*s)*s + o
    #   i/f/o lanes: s=0.5, o=0.5  (sigmoid(x) = 0.5*tanh(x/2) + 0.5)
    #   g   lanes:   s=1.0, o=0.0  (tanh)
    halfH = jnp.full((B, H), 0.5, f32)
    s_gate = jnp.concatenate([halfH, halfH, jnp.ones((B, H), f32), halfH], axis=1)
    o_gate = jnp.concatenate([halfH, halfH, jnp.zeros((B, H), f32), halfH], axis=1)

    h0 = jnp.zeros((B, H), f32)
    c0 = jnp.zeros((B, H), f32)
    h1 = jnp.zeros((B, H), f32)
    c1 = jnp.zeros((B, H), f32)

    for k in range(T + 1):            # static unroll: T+1 pipelined steps
        if k > 0:
            hh = jnp.concatenate([h0, h1], axis=1)              # (B, 2H)
            rec = jnp.dot(hh, w_rec, preferred_element_type=f32)  # (B, 2G)
            # ---- layer 1, time step k-1 (uses pre-update h0 via rec)
            g1 = rec[:, G:] + b1
            a1 = jnp.tanh(g1 * s_gate) * s_gate + o_gate
            c1 = a1[:, H:2 * H] * c1 + a1[:, :H] * a1[:, 2 * H:3 * H]
            h1 = a1[:, 3 * H:] * jnp.tanh(c1)
        if k < T:
            # ---- layer 0, time step k
            g0 = x0[:, k, :]
            if k > 0:
                g0 = g0 + rec[:, :G]
            a0 = jnp.tanh(g0 * s_gate) * s_gate + o_gate
            c0 = a0[:, H:2 * H] * c0 + a0[:, :H] * a0[:, 2 * H:3 * H]
            h0 = a0[:, 3 * H:] * jnp.tanh(c0)

    # q_embed = [h_l0 | h_l1 | c_l0 | c_l1]: single lane-dense (B, 128) value
    q_state = jnp.concatenate([h0, h1, c0, c1], axis=1)

    # ---- fc + tanh, fuse with image features, MLP head ---------------------
    # TODO(synk): both Dropout(p=0.5) layers in the MLP omitted (eval mode).
    x = jnp.tanh(
        jnp.dot(q_state, W("W_FC", 4 * H), preferred_element_type=f32)
        + Brow("B_FC"))
    x = x * img_features
    hmid = jnp.tanh(
        jnp.dot(x, W("W_MLP1", RNN_OUT), preferred_element_type=f32)
        + Brow("B_MLP1"))                                       # padded lanes -> 0
    out = (jnp.dot(hmid[:, :OUT_DIM], W("W_MLP2", OUT_DIM),
                   preferred_element_type=f32) + Brow("B_MLP2"))
    out_ref[...] = out[:, :OUT_DIM]


_fused_call = pl.pallas_call(
    deeper_lstm_kernel,
    out_shape=jax.ShapeDtypeStruct((B, OUT_DIM), jnp.float32),
    in_specs=[_VMEM, _VMEM, _VMEM],
    out_specs=_VMEM,
)


# ---------------------------------------------------------------- wrapper
def prepare_params(p):
    """One-time packing: transposed weights, combined LSTM biases, block-diag
    recurrent matrix, all zero-padded to 128 lanes in a single (600,128) slab."""
    slab = np.zeros((SLAB_ROWS, LANES), np.float32)

    def put(name, a):
        a = np.asarray(a, np.float32)
        o = OFF[name]
        slab[o:o + a.shape[0], :a.shape[1]] = a

    put("W_IMG", np.asarray(p["w_img"]).T)
    put("B_IMG", np.asarray(p["b_img"])[None, :])
    put("W_EMB", np.asarray(p["w_emb"]).T)
    put("B_EMB", np.asarray(p["b_emb"])[None, :])
    put("W_IH0", np.asarray(p["w_ih0"]).T)
    put("B0", (np.asarray(p["b_ih0"]) + np.asarray(p["b_hh0"]))[None, :])
    put("W_RECL", np.asarray(p["w_hh0"]).T)        # rows H:2H of block stay zero
    put("W_RECR", np.vstack([np.asarray(p["w_ih1"]).T, np.asarray(p["w_hh1"]).T]))
    put("B1", (np.asarray(p["b_ih1"]) + np.asarray(p["b_hh1"]))[None, :])
    put("W_FC", np.asarray(p["w_fc"]).T)
    put("B_FC", np.asarray(p["b_fc"])[None, :])
    put("W_MLP1", np.asarray(p["w_mlp1"]).T)
    put("B_MLP1", np.asarray(p["b_mlp1"])[None, :])
    put("W_MLP2", np.asarray(p["w_mlp2"]).T)
    put("B_MLP2", np.asarray(p["b_mlp2"])[None, :])
    return jnp.asarray(slab)


@jax.jit
def deeper_lstm_forward(img, ques, weight_slab):
    # No wrapper-side reshapes/transposes: exactly one pallas_call per forward.
    return _fused_call(img, ques, weight_slab)


# ---------------------------------------------------------------- reference (pure JAX)
def reference_forward(img, ques, p):
    img_n = img / jnp.sqrt(jnp.sum(img * img))
    img_features = jnp.tanh(img_n @ p["w_img"].T + p["b_img"])

    q = jnp.tanh(ques @ p["w_emb"].T + p["b_emb"])

    def lstm_layer(x_seq, w_ih, w_hh, b_ih, b_hh):
        H = HIDDEN
        h = jnp.zeros((B, H), jnp.float32)
        c = jnp.zeros((B, H), jnp.float32)
        hs = []
        for t in range(T):
            g = x_seq[:, t, :] @ w_ih.T + b_ih + h @ w_hh.T + b_hh
            i = jax.nn.sigmoid(g[:, :H])
            f = jax.nn.sigmoid(g[:, H:2 * H])
            gg = jnp.tanh(g[:, 2 * H:3 * H])
            o = jax.nn.sigmoid(g[:, 3 * H:])
            c = f * c + i * gg
            h = o * jnp.tanh(c)
            hs.append(h)
        return jnp.stack(hs, axis=1), h, c

    h_seq0, h0, c0 = lstm_layer(q, p["w_ih0"], p["w_hh0"], p["b_ih0"], p["b_hh0"])
    _, h1, c1 = lstm_layer(h_seq0, p["w_ih1"], p["w_hh1"], p["b_ih1"], p["b_hh1"])

    q_embed = jnp.concatenate([h0, h1, c0, c1], axis=1)
    x = jnp.tanh(q_embed @ p["w_fc"].T + p["b_fc"]) * img_features
    h = jnp.tanh(x @ p["w_mlp1"].T + p["b_mlp1"])
    return h @ p["w_mlp2"].T + p["b_mlp2"]


# ---------------------------------------------------------------- params
def init_params(key):
    def dense(k, out_f, in_f, scale=0.1):
        return scale * jax.random.normal(k, (out_f, in_f), jnp.float32)

    ks = jax.random.split(key, 20)
    p = {
        "w_img": dense(ks[0], IMAGE_EMBED, IMAGE_DIM),
        "b_img": 0.1 * jax.random.normal(ks[1], (IMAGE_EMBED,), jnp.float32),
        "w_emb": dense(ks[2], EMBED, VOCAB),
        "b_emb": 0.1 * jax.random.normal(ks[3], (EMBED,), jnp.float32),
        # LSTM layer 0 (input EMBED), layer 1 (input HIDDEN); PyTorch layout (4H, in)
        "w_ih0": dense(ks[4], 4 * HIDDEN, EMBED),
        "w_hh0": dense(ks[5], 4 * HIDDEN, HIDDEN),
        "b_ih0": 0.1 * jax.random.normal(ks[6], (4 * HIDDEN,), jnp.float32),
        "b_hh0": 0.1 * jax.random.normal(ks[7], (4 * HIDDEN,), jnp.float32),
        "w_ih1": dense(ks[8], 4 * HIDDEN, HIDDEN),
        "w_hh1": dense(ks[9], 4 * HIDDEN, HIDDEN),
        "b_ih1": 0.1 * jax.random.normal(ks[10], (4 * HIDDEN,), jnp.float32),
        "b_hh1": 0.1 * jax.random.normal(ks[11], (4 * HIDDEN,), jnp.float32),
        "w_fc": dense(ks[12], RNN_OUT, NUM_LAYERS * 2 * HIDDEN),
        "b_fc": 0.1 * jax.random.normal(ks[13], (RNN_OUT,), jnp.float32),
        "w_mlp1": dense(ks[14], OUT_DIM, RNN_OUT),
        "b_mlp1": 0.1 * jax.random.normal(ks[15], (OUT_DIM,), jnp.float32),
        "w_mlp2": dense(ks[16], OUT_DIM, OUT_DIM),
        "b_mlp2": 0.1 * jax.random.normal(ks[17], (OUT_DIM,), jnp.float32),
    }
    return p, ks[18], ks[19]


# ---------------------------------------------------------------- main
if __name__ == "__main__":
    params, k_img, k_q = init_params(jax.random.PRNGKey(0))
    img = jax.random.normal(k_img, (B, IMAGE_DIM), jnp.float32)
    ques = jax.random.normal(k_q, (B, T, VOCAB), jnp.float32)

    weight_slab = prepare_params(params)   # one-time packing

    out = jax.block_until_ready(deeper_lstm_forward(img, ques, weight_slab))
    ref = jax.block_until_ready(reference_forward(img, ques, params))

    # Tolerance slightly loosened vs 1e-4: sigmoid-via-tanh identity, rsqrt and
    # block-diagonal matmul reassociation change f32 rounding by ~1e-6.
    np.testing.assert_allclose(np.asarray(out), np.asarray(ref), rtol=5e-4, atol=5e-4)

    print("KERNEL_OK")
</pallas_src>

<mosaic_0001>
module attributes {stable_mosaic.version = 11 : i64} {
  func.func @deeper_lstm_kernel(%arg0: memref<2x64xf32, #tpu.memory_space<vmem>>, %arg1: memref<2x8x32xf32, #tpu.memory_space<vmem>>, %arg2: memref<600x128xf32, #tpu.memory_space<vmem>>, %arg3: memref<2x32xf32, #tpu.memory_space<vmem>>) attributes {dimension_semantics = [], scalar_prefetch = 0 : i64, scratch_operands = 0 : i64, tpu.core_type = #tpu.core_type<tc>} {
    %c0 = arith.constant 0 : index
    %c0_0 = arith.constant 0 : index
    %0 = vector.load %arg0[%c0, %c0_0] : memref<2x64xf32, #tpu.memory_space<vmem>>, vector<2x64xf32>
    %1 = arith.mulf %0, %0 : vector<2x64xf32>
    %2 = vector.shape_cast %1 : vector<2x64xf32> to vector<1x2x64xf32>
    %cst = arith.constant dense<0.000000e+00> : vector<1xf32>
    %3 = vector.multi_reduction <add>, %2, %cst [1, 2] : vector<1x2x64xf32> to vector<1xf32>
    %4 = vector.shape_cast %3 : vector<1xf32> to vector<1x1x1xf32>
    %5 = vector.extract %4[0, 0, 0] : f32 from vector<1x1x1xf32>
    %cst_1 = arith.constant 1.000000e-24 : f32
    %6 = arith.maximumf %5, %cst_1 : f32
    %7 = math.rsqrt %6 : f32
    %8 = vector.broadcast %7 : f32 to vector<2x64xf32>
    %9 = arith.mulf %0, %8 : vector<2x64xf32>
    %c0_2 = arith.constant 0 : index
    %c0_3 = arith.constant 0 : index
    %10 = vector.load %arg2[%c0_2, %c0_3] : memref<600x128xf32, #tpu.memory_space<vmem>>, vector<64x128xf32>
    %cst_4 = arith.constant dense<0.000000e+00> : vector<2x128xf32>
    %11 = tpu.matmul %9, %10, %cst_4 {dimension_numbers = #tpu.dot_dimension_numbers<[1], [0], [0], [1], [0, 0, 1, 1], [], []>} : vector<2x64xf32>, vector<64x128xf32>, vector<2x128xf32> -> vector<2x128xf32>
    %c64 = arith.constant 64 : index
    %c0_5 = arith.constant 0 : index
    %12 = vector.load %arg2[%c64, %c0_5] : memref<600x128xf32, #tpu.memory_space<vmem>>, vector<1x128xf32>
    %13 = vector.broadcast %12 : vector<1x128xf32> to vector<2x128xf32>
    %14 = arith.addf %11, %13 : vector<2x128xf32>
    %15 = math.tanh %14 : vector<2x128xf32>
    %c0_6 = arith.constant 0 : index
    %c0_7 = arith.constant 0 : index
    %c0_8 = arith.constant 0 : index
    %16 = vector.load %arg1[%c0_6, %c0_7, %c0_8] : memref<2x8x32xf32, #tpu.memory_space<vmem>>, vector<2x8x32xf32>
    %17 = vector.shape_cast %16 : vector<2x8x32xf32> to vector<16x32xf32>
    %c72 = arith.constant 72 : index
    %c0_9 = arith.constant 0 : index
    %18 = vector.load %arg2[%c72, %c0_9] : memref<600x128xf32, #tpu.memory_space<vmem>>, vector<32x128xf32>
    %cst_10 = arith.constant dense<0.000000e+00> : vector<16x128xf32>
    %19 = tpu.matmul %17, %18, %cst_10 {dimension_numbers = #tpu.dot_dimension_numbers<[1], [0], [0], [1], [0, 0, 1, 1], [], []>} : vector<16x32xf32>, vector<32x128xf32>, vector<16x128xf32> -> vector<16x128xf32>
    %c104 = arith.constant 104 : index
    %c0_11 = arith.constant 0 : index
    %20 = vector.load %arg2[%c104, %c0_11] : memref<600x128xf32, #tpu.memory_space<vmem>>, vector<1x128xf32>
    %21 = vector.broadcast %20 : vector<1x128xf32> to vector<16x128xf32>
    %22 = arith.addf %19, %21 : vector<16x128xf32>
    %23 = math.tanh %22 : vector<16x128xf32>
    %24 = vector.extract_strided_slice %23 {offsets = [0, 0], sizes = [16, 32], strides = [1, 1]} : vector<16x128xf32> to vector<16x32xf32>
    %c112 = arith.constant 112 : index
    %c0_12 = arith.constant 0 : index
    %25 = vector.load %arg2[%c112, %c0_12] : memref<600x128xf32, #tpu.memory_space<vmem>>, vector<32x128xf32>
    %cst_13 = arith.constant dense<0.000000e+00> : vector<16x128xf32>
    %26 = tpu.matmul %24, %25, %cst_13 {dimension_numbers = #tpu.dot_dimension_numbers<[1], [0], [0], [1], [0, 0, 1, 1], [], []>} : vector<16x32xf32>, vector<32x128xf32>, vector<16x128xf32> -> vector<16x128xf32>
    %c144 = arith.constant 144 : index
    %c0_14 = arith.constant 0 : index
    %27 = vector.load %arg2[%c144, %c0_14] : memref<600x128xf32, #tpu.memory_space<vmem>>, vector<1x128xf32>
    %28 = vector.broadcast %27 : vector<1x128xf32> to vector<16x128xf32>
    %29 = arith.addf %26, %28 : vector<16x128xf32>
    %30 = vector.shape_cast %29 : vector<16x128xf32> to vector<2x8x128xf32>
    %c152 = arith.constant 152 : index
    %c0_15 = arith.constant 0 : index
    %31 = vector.load %arg2[%c152, %c0_15] : memref<600x128xf32, #tpu.memory_space<vmem>>, vector<64x128xf32>
    %c216 = arith.constant 216 : index
    %c0_16 = arith.constant 0 : index
    %32 = vector.load %arg2[%c216, %c0_16] : memref<600x128xf32, #tpu.memory_space<vmem>>, vector<64x128xf32>
    %33 = tpu.concatenate %31, %32 in 1 : vector<64x128xf32>, vector<64x128xf32> -> vector<64x256xf32>
    %c280 = arith.constant 280 : index
    %c0_17 = arith.constant 0 : index
    %34 = vector.load %arg2[%c280, %c0_17] : memref<600x128xf32, #tpu.memory_space<vmem>>, vector<1x128xf32>
    %cst_18 = arith.constant 5.000000e-01 : f32
    %35 = vector.broadcast %cst_18 : f32 to vector<2x32xf32>
    %cst_19 = arith.constant 1.000000e+00 : f32
    %36 = vector.broadcast %cst_19 : f32 to vector<2x32xf32>
    %37 = tpu.concatenate %35, %35, %36, %35 in 1 : vector<2x32xf32>, vector<2x32xf32>, vector<2x32xf32>, vector<2x32xf32> -> vector<2x128xf32>
    %cst_20 = arith.constant 0.000000e+00 : f32
    %38 = vector.broadcast %cst_20 : f32 to vector<2x32xf32>
    %39 = tpu.concatenate %35, %35, %38, %35 in 1 : vector<2x32xf32>, vector<2x32xf32>, vector<2x32xf32>, vector<2x32xf32> -> vector<2x128xf32>
    %cst_21 = arith.constant 0.000000e+00 : f32
    %40 = vector.broadcast %cst_21 : f32 to vector<2x32xf32>
    %cst_22 = arith.constant 0.000000e+00 : f32
    %41 = vector.broadcast %cst_22 : f32 to vector<2x32xf32>
    %cst_23 = arith.constant 0.000000e+00 : f32
    %42 = vector.broadcast %cst_23 : f32 to vector<2x32xf32>
    %43 = vector.extract_strided_slice %30 {offsets = [0, 0, 0], sizes = [2, 1, 128], strides = [1, 1, 1]} : vector<2x8x128xf32> to vector<2x1x128xf32>
    %44 = vector.shape_cast %43 : vector<2x1x128xf32> to vector<2x128xf32>
    %45 = arith.mulf %44, %37 : vector<2x128xf32>
    %46 = math.tanh %45 : vector<2x128xf32>
    %47 = arith.mulf %46, %37 : vector<2x128xf32>
    %48 = arith.addf %47, %39 : vector<2x128xf32>
    %49 = vector.extract_strided_slice %48 {offsets = [0, 32], sizes = [2, 32], strides = [1, 1]} : vector<2x128xf32> to vector<2x32xf32>
    %50 = arith.mulf %49, %40 : vector<2x32xf32>
    %51 = vector.extract_strided_slice %48 {offsets = [0, 0], sizes = [2, 32], strides = [1, 1]} : vector<2x128xf32> to vector<2x32xf32>
    %52 = vector.extract_strided_slice %48 {offsets = [0, 64], sizes = [2, 32], strides = [1, 1]} : vector<2x128xf32> to vector<2x32xf32>
    %53 = arith.mulf %51, %52 : vector<2x32xf32>
    %54 = arith.addf %50, %53 : vector<2x32xf32>
    %55 = vector.extract_strided_slice %48 {offsets = [0, 96], sizes = [2, 32], strides = [1, 1]} : vector<2x128xf32> to vector<2x32xf32>
    %56 = math.tanh %54 : vector<2x32xf32>
    %57 = arith.mulf %55, %56 : vector<2x32xf32>
    %58 = tpu.concatenate %57, %41 in 1 : vector<2x32xf32>, vector<2x32xf32> -> vector<2x64xf32>
    %cst_24 = arith.constant dense<0.000000e+00> : vector<2x256xf32>
    %59 = tpu.matmul %58, %33, %cst_24 {dimension_numbers = #tpu.dot_dimension_numbers<[1], [0], [0], [1], [0, 0, 1, 1], [], []>} : vector<2x64xf32>, vector<64x256xf32>, vector<2x256xf32> -> vector<2x256xf32>
    %60 = vector.extract_strided_slice %59 {offsets = [0, 128], sizes = [2, 128], strides = [1, 1]} : vector<2x256xf32> to vector<2x128xf32>
    %61 = vector.broadcast %34 : vector<1x128xf32> to vector<2x128xf32>
    %62 = arith.addf %60, %61 : vector<2x128xf32>
    %63 = arith.mulf %62, %37 : vector<2x128xf32>
    %64 = math.tanh %63 : vector<2x128xf32>
    %65 = arith.mulf %64, %37 : vector<2x128xf32>
    %66 = arith.addf %65, %39 : vector<2x128xf32>
    %67 = vector.extract_strided_slice %66 {offsets = [0, 32], sizes = [2, 32], strides = [1, 1]} : vector<2x128xf32> to vector<2x32xf32>
    %68 = arith.mulf %67, %42 : vector<2x32xf32>
    %69 = vector.extract_strided_slice %66 {offsets = [0, 0], sizes = [2, 32], strides = [1, 1]} : vector<2x128xf32> to vector<2x32xf32>
    %70 = vector.extract_strided_slice %66 {offsets = [0, 64], sizes = [2, 32], strides = [1, 1]} : vector<2x128xf32> to vector<2x32xf32>
    %71 = arith.mulf %69, %70 : vector<2x32xf32>
    %72 = arith.addf %68, %71 : vector<2x32xf32>
    %73 = vector.extract_strided_slice %66 {offsets = [0, 96], sizes = [2, 32], strides = [1, 1]} : vector<2x128xf32> to vector<2x32xf32>
    %74 = math.tanh %72 : vector<2x32xf32>
    %75 = arith.mulf %73, %74 : vector<2x32xf32>
    %76 = vector.extract_strided_slice %30 {offsets = [0, 1, 0], sizes = [2, 1, 128], strides = [1, 1, 1]} : vector<2x8x128xf32> to vector<2x1x128xf32>
    %77 = vector.shape_cast %76 : vector<2x1x128xf32> to vector<2x128xf32>
    %78 = vector.extract_strided_slice %59 {offsets = [0, 0], sizes = [2, 128], strides = [1, 1]} : vector<2x256xf32> to vector<2x128xf32>
    %79 = arith.addf %77, %78 : vector<2x128xf32>
    %80 = arith.mulf %79, %37 : vector<2x128xf32>
    %81 = math.tanh %80 : vector<2x128xf32>
    %82 = arith.mulf %81, %37 : vector<2x128xf32>
    %83 = arith.addf %82, %39 : vector<2x128xf32>
    %84 = vector.extract_strided_slice %83 {offsets = [0, 32], sizes = [2, 32], strides = [1, 1]} : vector<2x128xf32> to vector<2x32xf32>
    %85 = arith.mulf %84, %54 : vector<2x32xf32>
    %86 = vector.extract_strided_slice %83 {offsets = [0, 0], sizes = [2, 32], strides = [1, 1]} : vector<2x128xf32> to vector<2x32xf32>
    %87 = vector.extract_strided_slice %83 {offsets = [0, 64], sizes = [2, 32], strides = [1, 1]} : vector<2x128xf32> to vector<2x32xf32>
    %88 = arith.mulf %86, %87 : vector<2x32xf32>
    %89 = arith.addf %85, %88 : vector<2x32xf32>
    %90 = vector.extract_strided_slice %83 {offsets = [0, 96], sizes = [2, 32], strides = [1, 1]} : vector<2x128xf32> to vector<2x32xf32>
    %91 = math.tanh %89 : vector<2x32xf32>
    %92 = arith.mulf %90, %91 : vector<2x32xf32>
    %93 = tpu.concatenate %92, %75 in 1 : vector<2x32xf32>, vector<2x32xf32> -> vector<2x64xf32>
    %cst_25 = arith.constant dense<0.000000e+00> : vector<2x256xf32>
    %94 = tpu.matmul %93, %33, %cst_25 {dimension_numbers = #tpu.dot_dimension_numbers<[1], [0], [0], [1], [0, 0, 1, 1], [], []>} : vector<2x64xf32>, vector<64x256xf32>, vector<2x256xf32> -> vector<2x256xf32>
    %95 = vector.extract_strided_slice %94 {offsets = [0, 128], sizes = [2, 128], strides = [1, 1]} : vector<2x256xf32> to vector<2x128xf32>
    %96 = vector.broadcast %34 : vector<1x128xf32> to vector<2x128xf32>
    %97 = arith.addf %95, %96 : vector<2x128xf32>
    %98 = arith.mulf %97, %37 : vector<2x128xf32>
    %99 = math.tanh %98 : vector<2x128xf32>
    %100 = arith.mulf %99, %37 : vector<2x128xf32>
    %101 = arith.addf %100, %39 : vector<2x128xf32>
    %102 = vector.extract_strided_slice %101 {offsets = [0, 32], sizes = [2, 32], strides = [1, 1]} : vector<2x128xf32> to vector<2x32xf32>
    %103 = arith.mulf %102, %72 : vector<2x32xf32>
    %104 = vector.extract_strided_slice %101 {offsets = [0, 0], sizes = [2, 32], strides = [1, 1]} : vector<2x128xf32> to vector<2x32xf32>
    %105 = vector.extract_strided_slice %101 {offsets = [0, 64], sizes = [2, 32], strides = [1, 1]} : vector<2x128xf32> to vector<2x32xf32>
    %106 = arith.mulf %104, %105 : vector<2x32xf32>
    %107 = arith.addf %103, %106 : vector<2x32xf32>
    %108 = vector.extract_strided_slice %101 {offsets = [0, 96], sizes = [2, 32], strides = [1, 1]} : vector<2x128xf32> to vector<2x32xf32>
    %109 = math.tanh %107 : vector<2x32xf32>
    %110 = arith.mulf %108, %109 : vector<2x32xf32>
    %111 = vector.extract_strided_slice %30 {offsets = [0, 2, 0], sizes = [2, 1, 128], strides = [1, 1, 1]} : vector<2x8x128xf32> to vector<2x1x128xf32>
    %112 = vector.shape_cast %111 : vector<2x1x128xf32> to vector<2x128xf32>
    %113 = vector.extract_strided_slice %94 {offsets = [0, 0], sizes = [2, 128], strides = [1, 1]} : vector<2x256xf32> to vector<2x128xf32>
    %114 = arith.addf %112, %113 : vector<2x128xf32>
    %115 = arith.mulf %114, %37 : vector<2x128xf32>
    %116 = math.tanh %115 : vector<2x128xf32>
    %117 = arith.mulf %116, %37 : vector<2x128xf32>
    %118 = arith.addf %117, %39 : vector<2x128xf32>
    %119 = vector.extract_strided_slice %118 {offsets = [0, 32], sizes = [2, 32], strides = [1, 1]} : vector<2x128xf32> to vector<2x32xf32>
    %120 = arith.mulf %119, %89 : vector<2x32xf32>
    %121 = vector.extract_strided_slice %118 {offsets = [0, 0], sizes = [2, 32], strides = [1, 1]} : vector<2x128xf32> to vector<2x32xf32>
    %122 = vector.extract_strided_slice %118 {offsets = [0, 64], sizes = [2, 32], strides = [1, 1]} : vector<2x128xf32> to vector<2x32xf32>
    %123 = arith.mulf %121, %122 : vector<2x32xf32>
    %124 = arith.addf %120, %123 : vector<2x32xf32>
    %125 = vector.extract_strided_slice %118 {offsets = [0, 96], sizes = [2, 32], strides = [1, 1]} : vector<2x128xf32> to vector<2x32xf32>
    %126 = math.tanh %124 : vector<2x32xf32>
    %127 = arith.mulf %125, %126 : vector<2x32xf32>
    %128 = tpu.concatenate %127, %110 in 1 : vector<2x32xf32>, vector<2x32xf32> -> vector<2x64xf32>
    %cst_26 = arith.constant dense<0.000000e+00> : vector<2x256xf32>
    %129 = tpu.matmul %128, %33, %cst_26 {dimension_numbers = #tpu.dot_dimension_numbers<[1], [0], [0], [1], [0, 0, 1, 1], [], []>} : vector<2x64xf32>, vector<64x256xf32>, vector<2x256xf32> -> vector<2x256xf32>
    %130 = vector.extract_strided_slice %129 {offsets = [0, 128], sizes = [2, 128], strides = [1, 1]} : vector<2x256xf32> to vector<2x128xf32>
    %131 = vector.broadcast %34 : vector<1x128xf32> to vector<2x128xf32>
    %132 = arith.addf %130, %131 : vector<2x128xf32>
    %133 = arith.mulf %132, %37 : vector<2x128xf32>
    %134 = math.tanh %133 : vector<2x128xf32>
    %135 = arith.mulf %134, %37 : vector<2x128xf32>
    %136 = arith.addf %135, %39 : vector<2x128xf32>
    %137 = vector.extract_strided_slice %136 {offsets = [0, 32], sizes = [2, 32], strides = [1, 1]} : vector<2x128xf32> to vector<2x32xf32>
    %138 = arith.mulf %137, %107 : vector<2x32xf32>
    %139 = vector.extract_strided_slice %136 {offsets = [0, 0], sizes = [2, 32], strides = [1, 1]} : vector<2x128xf32> to vector<2x32xf32>
    %140 = vector.extract_strided_slice %136 {offsets = [0, 64], sizes = [2, 32], strides = [1, 1]} : vector<2x128xf32> to vector<2x32xf32>
    %141 = arith.mulf %139, %140 : vector<2x32xf32>
    %142 = arith.addf %138, %141 : vector<2x32xf32>
    %143 = vector.extract_strided_slice %136 {offsets = [0, 96], sizes = [2, 32], strides = [1, 1]} : vector<2x128xf32> to vector<2x32xf32>
    %144 = math.tanh %142 : vector<2x32xf32>
    %145 = arith.mulf %143, %144 : vector<2x32xf32>
    %146 = vector.extract_strided_slice %30 {offsets = [0, 3, 0], sizes = [2, 1, 128], strides = [1, 1, 1]} : vector<2x8x128xf32> to vector<2x1x128xf32>
    %147 = vector.shape_cast %146 : vector<2x1x128xf32> to vector<2x128xf32>
    %148 = vector.extract_strided_slice %129 {offsets = [0, 0], sizes = [2, 128], strides = [1, 1]} : vector<2x256xf32> to vector<2x128xf32>
    %149 = arith.addf %147, %148 : vector<2x128xf32>
    %150 = arith.mulf %149, %37 : vector<2x128xf32>
    %151 = math.tanh %150 : vector<2x128xf32>
    %152 = arith.mulf %151, %37 : vector<2x128xf32>
    %153 = arith.addf %152, %39 : vector<2x128xf32>
    %154 = vector.extract_strided_slice %153 {offsets = [0, 32], sizes = [2, 32], strides = [1, 1]} : vector<2x128xf32> to vector<2x32xf32>
    %155 = arith.mulf %154, %124 : vector<2x32xf32>
    %156 = vector.extract_strided_slice %153 {offsets = [0, 0], sizes = [2, 32], strides = [1, 1]} : vector<2x128xf32> to vector<2x32xf32>
    %157 = vector.extract_strided_slice %153 {offsets = [0, 64], sizes = [2, 32], strides = [1, 1]} : vector<2x128xf32> to vector<2x32xf32>
    %158 = arith.mulf %156, %157 : vector<2x32xf32>
    %159 = arith.addf %155, %158 : vector<2x32xf32>
    %160 = vector.extract_strided_slice %153 {offsets = [0, 96], sizes = [2, 32], strides = [1, 1]} : vector<2x128xf32> to vector<2x32xf32>
    %161 = math.tanh %159 : vector<2x32xf32>
    %162 = arith.mulf %160, %161 : vector<2x32xf32>
    %163 = tpu.concatenate %162, %145 in 1 : vector<2x32xf32>, vector<2x32xf32> -> vector<2x64xf32>
    %cst_27 = arith.constant dense<0.000000e+00> : vector<2x256xf32>
    %164 = tpu.matmul %163, %33, %cst_27 {dimension_numbers = #tpu.dot_dimension_numbers<[1], [0], [0], [1], [0, 0, 1, 1], [], []>} : vector<2x64xf32>, vector<64x256xf32>, vector<2x256xf32> -> vector<2x256xf32>
    %165 = vector.extract_strided_slice %164 {offsets = [0, 128], sizes = [2, 128], strides = [1, 1]} : vector<2x256xf32> to vector<2x128xf32>
    %166 = vector.broadcast %34 : vector<1x128xf32> to vector<2x128xf32>
    %167 = arith.addf %165, %166 : vector<2x128xf32>
    %168 = arith.mulf %167, %37 : vector<2x128xf32>
    %169 = math.tanh %168 : vector<2x128xf32>
    %170 = arith.mulf %169, %37 : vector<2x128xf32>
    %171 = arith.addf %170, %39 : vector<2x128xf32>
    %172 = vector.extract_strided_slice %171 {offsets = [0, 32], sizes = [2, 32], strides = [1, 1]} : vector<2x128xf32> to vector<2x32xf32>
    %173 = arith.mulf %172, %142 : vector<2x32xf32>
    %174 = vector.extract_strided_slice %171 {offsets = [0, 0], sizes = [2, 32], strides = [1, 1]} : vector<2x128xf32> to vector<2x32xf32>
    %175 = vector.extract_strided_slice %171 {offsets = [0, 64], sizes = [2, 32], strides = [1, 1]} : vector<2x128xf32> to vector<2x32xf32>
    %176 = arith.mulf %174, %175 : vector<2x32xf32>
    %177 = arith.addf %173, %176 : vector<2x32xf32>
    %178 = vector.extract_strided_slice %171 {offsets = [0, 96], sizes = [2, 32], strides = [1, 1]} : vector<2x128xf32> to vector<2x32xf32>
    %179 = math.tanh %177 : vector<2x32xf32>
    %180 = arith.mulf %178, %179 : vector<2x32xf32>
    %181 = vector.extract_strided_slice %30 {offsets = [0, 4, 0], sizes = [2, 1, 128], strides = [1, 1, 1]} : vector<2x8x128xf32> to vector<2x1x128xf32>
    %182 = vector.shape_cast %181 : vector<2x1x128xf32> to vector<2x128xf32>
    %183 = vector.extract_strided_slice %164 {offsets = [0, 0], sizes = [2, 128], strides = [1, 1]} : vector<2x256xf32> to vector<2x128xf32>
    %184 = arith.addf %182, %183 : vector<2x128xf32>
    %185 = arith.mulf %184, %37 : vector<2x128xf32>
    %186 = math.tanh %185 : vector<2x128xf32>
    %187 = arith.mulf %186, %37 : vector<2x128xf32>
    %188 = arith.addf %187, %39 : vector<2x128xf32>
    %189 = vector.extract_strided_slice %188 {offsets = [0, 32], sizes = [2, 32], strides = [1, 1]} : vector<2x128xf32> to vector<2x32xf32>
    %190 = arith.mulf %189, %159 : vector<2x32xf32>
    %191 = vector.extract_strided_slice %188 {offsets = [0, 0], sizes = [2, 32], strides = [1, 1]} : vector<2x128xf32> to vector<2x32xf32>
    %192 = vector.extract_strided_slice %188 {offsets = [0, 64], sizes = [2, 32], strides = [1, 1]} : vector<2x128xf32> to vector<2x32xf32>
    %193 = arith.mulf %191, %192 : vector<2x32xf32>
    %194 = arith.addf %190, %193 : vector<2x32xf32>
    %195 = vector.extract_strided_slice %188 {offsets = [0, 96], sizes = [2, 32], strides = [1, 1]} : vector<2x128xf32> to vector<2x32xf32>
    %196 = math.tanh %194 : vector<2x32xf32>
    %197 = arith.mulf %195, %196 : vector<2x32xf32>
    %198 = tpu.concatenate %197, %180 in 1 : vector<2x32xf32>, vector<2x32xf32> -> vector<2x64xf32>
    %cst_28 = arith.constant dense<0.000000e+00> : vector<2x256xf32>
    %199 = tpu.matmul %198, %33, %cst_28 {dimension_numbers = #tpu.dot_dimension_numbers<[1], [0], [0], [1], [0, 0, 1, 1], [], []>} : vector<2x64xf32>, vector<64x256xf32>, vector<2x256xf32> -> vector<2x256xf32>
    %200 = vector.extract_strided_slice %199 {offsets = [0, 128], sizes = [2, 128], strides = [1, 1]} : vector<2x256xf32> to vector<2x128xf32>
    %201 = vector.broadcast %34 : vector<1x128xf32> to vector<2x128xf32>
    %202 = arith.addf %200, %201 : vector<2x128xf32>
    %203 = arith.mulf %202, %37 : vector<2x128xf32>
    %204 = math.tanh %203 : vector<2x128xf32>
    %205 = arith.mulf %204, %37 : vector<2x128xf32>
    %206 = arith.addf %205, %39 : vector<2x128xf32>
    %207 = vector.extract_strided_slice %206 {offsets = [0, 32], sizes = [2, 32], strides = [1, 1]} : vector<2x128xf32> to vector<2x32xf32>
    %208 = arith.mulf %207, %177 : vector<2x32xf32>
    %209 = vector.extract_strided_slice %206 {offsets = [0, 0], sizes = [2, 32], strides = [1, 1]} : vector<2x128xf32> to vector<2x32xf32>
    %210 = vector.extract_strided_slice %206 {offsets = [0, 64], sizes = [2, 32], strides = [1, 1]} : vector<2x128xf32> to vector<2x32xf32>
    %211 = arith.mulf %209, %210 : vector<2x32xf32>
    %212 = arith.addf %208, %211 : vector<2x32xf32>
    %213 = vector.extract_strided_slice %206 {offsets = [0, 96], sizes = [2, 32], strides = [1, 1]} : vector<2x128xf32> to vector<2x32xf32>
    %214 = math.tanh %212 : vector<2x32xf32>
    %215 = arith.mulf %213, %214 : vector<2x32xf32>
    %216 = vector.extract_strided_slice %30 {offsets = [0, 5, 0], sizes = [2, 1, 128], strides = [1, 1, 1]} : vector<2x8x128xf32> to vector<2x1x128xf32>
    %217 = vector.shape_cast %216 : vector<2x1x128xf32> to vector<2x128xf32>
    %218 = vector.extract_strided_slice %199 {offsets = [0, 0], sizes = [2, 128], strides = [1, 1]} : vector<2x256xf32> to vector<2x128xf32>
    %219 = arith.addf %217, %218 : vector<2x128xf32>
    %220 = arith.mulf %219, %37 : vector<2x128xf32>
    %221 = math.tanh %220 : vector<2x128xf32>
    %222 = arith.mulf %221, %37 : vector<2x128xf32>
    %223 = arith.addf %222, %39 : vector<2x128xf32>
    %224 = vector.extract_strided_slice %223 {offsets = [0, 32], sizes = [2, 32], strides = [1, 1]} : vector<2x128xf32> to vector<2x32xf32>
    %225 = arith.mulf %224, %194 : vector<2x32xf32>
    %226 = vector.extract_strided_slice %223 {offsets = [0, 0], sizes = [2, 32], strides = [1, 1]} : vector<2x128xf32> to vector<2x32xf32>
    %227 = vector.extract_strided_slice %223 {offsets = [0, 64], sizes = [2, 32], strides = [1, 1]} : vector<2x128xf32> to vector<2x32xf32>
    %228 = arith.mulf %226, %227 : vector<2x32xf32>
    %229 = arith.addf %225, %228 : vector<2x32xf32>
    %230 = vector.extract_strided_slice %223 {offsets = [0, 96], sizes = [2, 32], strides = [1, 1]} : vector<2x128xf32> to vector<2x32xf32>
    %231 = math.tanh %229 : vector<2x32xf32>
    %232 = arith.mulf %230, %231 : vector<2x32xf32>
    %233 = tpu.concatenate %232, %215 in 1 : vector<2x32xf32>, vector<2x32xf32> -> vector<2x64xf32>
    %cst_29 = arith.constant dense<0.000000e+00> : vector<2x256xf32>
    %234 = tpu.matmul %233, %33, %cst_29 {dimension_numbers = #tpu.dot_dimension_numbers<[1], [0], [0], [1], [0, 0, 1, 1], [], []>} : vector<2x64xf32>, vector<64x256xf32>, vector<2x256xf32> -> vector<2x256xf32>
    %235 = vector.extract_strided_slice %234 {offsets = [0, 128], sizes = [2, 128], strides = [1, 1]} : vector<2x256xf32> to vector<2x128xf32>
    %236 = vector.broadcast %34 : vector<1x128xf32> to vector<2x128xf32>
    %237 = arith.addf %235, %236 : vector<2x128xf32>
    %238 = arith.mulf %237, %37 : vector<2x128xf32>
    %239 = math.tanh %238 : vector<2x128xf32>
    %240 = arith.mulf %239, %37 : vector<2x128xf32>
    %241 = arith.addf %240, %39 : vector<2x128xf32>
    %242 = vector.extract_strided_slice %241 {offsets = [0, 32], sizes = [2, 32], strides = [1, 1]} : vector<2x128xf32> to vector<2x32xf32>
    %243 = arith.mulf %242, %212 : vector<2x32xf32>
    %244 = vector.extract_strided_slice %241 {offsets = [0, 0], sizes = [2, 32], strides = [1, 1]} : vector<2x128xf32> to vector<2x32xf32>
    %245 = vector.extract_strided_slice %241 {offsets = [0, 64], sizes = [2, 32], strides = [1, 1]} : vector<2x128xf32> to vector<2x32xf32>
    %246 = arith.mulf %244, %245 : vector<2x32xf32>
    %247 = arith.addf %243, %246 : vector<2x32xf32>
    %248 = vector.extract_strided_slice %241 {offsets = [0, 96], sizes = [2, 32], strides = [1, 1]} : vector<2x128xf32> to vector<2x32xf32>
    %249 = math.tanh %247 : vector<2x32xf32>
    %250 = arith.mulf %248, %249 : vector<2x32xf32>
    %251 = vector.extract_strided_slice %30 {offsets = [0, 6, 0], sizes = [2, 1, 128], strides = [1, 1, 1]} : vector<2x8x128xf32> to vector<2x1x128xf32>
    %252 = vector.shape_cast %251 : vector<2x1x128xf32> to vector<2x128xf32>
    %253 = vector.extract_strided_slice %234 {offsets = [0, 0], sizes = [2, 128], strides = [1, 1]} : vector<2x256xf32> to vector<2x128xf32>
    %254 = arith.addf %252, %253 : vector<2x128xf32>
    %255 = arith.mulf %254, %37 : vector<2x128xf32>
    %256 = math.tanh %255 : vector<2x128xf32>
    %257 = arith.mulf %256, %37 : vector<2x128xf32>
    %258 = arith.addf %257, %39 : vector<2x128xf32>
    %259 = vector.extract_strided_slice %258 {offsets = [0, 32], sizes = [2, 32], strides = [1, 1]} : vector<2x128xf32> to vector<2x32xf32>
    %260 = arith.mulf %259, %229 : vector<2x32xf32>
    %261 = vector.extract_strided_slice %258 {offsets = [0, 0], sizes = [2, 32], strides = [1, 1]} : vector<2x128xf32> to vector<2x32xf32>
    %262 = vector.extract_strided_slice %258 {offsets = [0, 64], sizes = [2, 32], strides = [1, 1]} : vector<2x128xf32> to vector<2x32xf32>
    %263 = arith.mulf %261, %262 : vector<2x32xf32>
    %264 = arith.addf %260, %263 : vector<2x32xf32>
    %265 = vector.extract_strided_slice %258 {offsets = [0, 96], sizes = [2, 32], strides = [1, 1]} : vector<2x128xf32> to vector<2x32xf32>
    %266 = math.tanh %264 : vector<2x32xf32>
    %267 = arith.mulf %265, %266 : vector<2x32xf32>
    %268 = tpu.concatenate %267, %250 in 1 : vector<2x32xf32>, vector<2x32xf32> -> vector<2x64xf32>
    %cst_30 = arith.constant dense<0.000000e+00> : vector<2x256xf32>
    %269 = tpu.matmul %268, %33, %cst_30 {dimension_numbers = #tpu.dot_dimension_numbers<[1], [0], [0], [1], [0, 0, 1, 1], [], []>} : vector<2x64xf32>, vector<64x256xf32>, vector<2x256xf32> -> vector<2x256xf32>
    %270 = vector.extract_strided_slice %269 {offsets = [0, 128], sizes = [2, 128], strides = [1, 1]} : vector<2x256xf32> to vector<2x128xf32>
    %271 = vector.broadcast %34 : vector<1x128xf32> to vector<2x128xf32>
    %272 = arith.addf %270, %271 : vector<2x128xf32>
    %273 = arith.mulf %272, %37 : vector<2x128xf32>
    %274 = math.tanh %273 : vector<2x128xf32>
    %275 = arith.mulf %274, %37 : vector<2x128xf32>
    %276 = arith.addf %275, %39 : vector<2x128xf32>
    %277 = vector.extract_strided_slice %276 {offsets = [0, 32], sizes = [2, 32], strides = [1, 1]} : vector<2x128xf32> to vector<2x32xf32>
    %278 = arith.mulf %277, %247 : vector<2x32xf32>
    %279 = vector.extract_strided_slice %276 {offsets = [0, 0], sizes = [2, 32], strides = [1, 1]} : vector<2x128xf32> to vector<2x32xf32>
    %280 = vector.extract_strided_slice %276 {offsets = [0, 64], sizes = [2, 32], strides = [1, 1]} : vector<2x128xf32> to vector<2x32xf32>
    %281 = arith.mulf %279, %280 : vector<2x32xf32>
    %282 = arith.addf %278, %281 : vector<2x32xf32>
    %283 = vector.extract_strided_slice %276 {offsets = [0, 96], sizes = [2, 32], strides = [1, 1]} : vector<2x128xf32> to vector<2x32xf32>
    %284 = math.tanh %282 : vector<2x32xf32>
    %285 = arith.mulf %283, %284 : vector<2x32xf32>
    %286 = vector.extract_strided_slice %30 {offsets = [0, 7, 0], sizes = [2, 1, 128], strides = [1, 1, 1]} : vector<2x8x128xf32> to vector<2x1x128xf32>
    %287 = vector.shape_cast %286 : vector<2x1x128xf32> to vector<2x128xf32>
    %288 = vector.extract_strided_slice %269 {offsets = [0, 0], sizes = [2, 128], strides = [1, 1]} : vector<2x256xf32> to vector<2x128xf32>
    %289 = arith.addf %287, %288 : vector<2x128xf32>
    %290 = arith.mulf %289, %37 : vector<2x128xf32>
    %291 = math.tanh %290 : vector<2x128xf32>
    %292 = arith.mulf %291, %37 : vector<2x128xf32>
    %293 = arith.addf %292, %39 : vector<2x128xf32>
    %294 = vector.extract_strided_slice %293 {offsets = [0, 32], sizes = [2, 32], strides = [1, 1]} : vector<2x128xf32> to vector<2x32xf32>
    %295 = arith.mulf %294, %264 : vector<2x32xf32>
    %296 = vector.extract_strided_slice %293 {offsets = [0, 0], sizes = [2, 32], strides = [1, 1]} : vector<2x128xf32> to vector<2x32xf32>
    %297 = vector.extract_strided_slice %293 {offsets = [0, 64], sizes = [2, 32], strides = [1, 1]} : vector<2x128xf32> to vector<2x32xf32>
    %298 = arith.mulf %296, %297 : vector<2x32xf32>
    %299 = arith.addf %295, %298 : vector<2x32xf32>
    %300 = vector.extract_strided_slice %293 {offsets = [0, 96], sizes = [2, 32], strides = [1, 1]} : vector<2x128xf32> to vector<2x32xf32>
    %301 = math.tanh %299 : vector<2x32xf32>
    %302 = arith.mulf %300, %301 : vector<2x32xf32>
    %303 = tpu.concatenate %302, %285 in 1 : vector<2x32xf32>, vector<2x32xf32> -> vector<2x64xf32>
    %cst_31 = arith.constant dense<0.000000e+00> : vector<2x256xf32>
    %304 = tpu.matmul %303, %33, %cst_31 {dimension_numbers = #tpu.dot_dimension_numbers<[1], [0], [0], [1], [0, 0, 1, 1], [], []>} : vector<2x64xf32>, vector<64x256xf32>, vector<2x256xf32> -> vector<2x256xf32>
    %305 = vector.extract_strided_slice %304 {offsets = [0, 128], sizes = [2, 128], strides = [1, 1]} : vector<2x256xf32> to vector<2x128xf32>
    %306 = vector.broadcast %34 : vector<1x128xf32> to vector<2x128xf32>
    %307 = arith.addf %305, %306 : vector<2x128xf32>
    %308 = arith.mulf %307, %37 : vector<2x128xf32>
    %309 = math.tanh %308 : vector<2x128xf32>
    %310 = arith.mulf %309, %37 : vector<2x128xf32>
    %311 = arith.addf %310, %39 : vector<2x128xf32>
    %312 = vector.extract_strided_slice %311 {offsets = [0, 32], sizes = [2, 32], strides = [1, 1]} : vector<2x128xf32> to vector<2x32xf32>
    %313 = arith.mulf %312, %282 : vector<2x32xf32>
    %314 = vector.extract_strided_slice %311 {offsets = [0, 0], sizes = [2, 32], strides = [1, 1]} : vector<2x128xf32> to vector<2x32xf32>
    %315 = vector.extract_strided_slice %311 {offsets = [0, 64], sizes = [2, 32], strides = [1, 1]} : vector<2x128xf32> to vector<2x32xf32>
    %316 = arith.mulf %314, %315 : vector<2x32xf32>
    %317 = arith.addf %313, %316 : vector<2x32xf32>
    %318 = vector.extract_strided_slice %311 {offsets = [0, 96], sizes = [2, 32], strides = [1, 1]} : vector<2x128xf32> to vector<2x32xf32>
    %319 = math.tanh %317 : vector<2x32xf32>
    %320 = arith.mulf %318, %319 : vector<2x32xf32>
    %321 = tpu.concatenate %302, %320, %299, %317 in 1 : vector<2x32xf32>, vector<2x32xf32>, vector<2x32xf32>, vector<2x32xf32> -> vector<2x128xf32>
    %c288 = arith.constant 288 : index
    %c0_32 = arith.constant 0 : index
    %322 = vector.load %arg2[%c288, %c0_32] : memref<600x128xf32, #tpu.memory_space<vmem>>, vector<128x128xf32>
    %cst_33 = arith.constant dense<0.000000e+00> : vector<2x128xf32>
    %323 = tpu.matmul %321, %322, %cst_33 {dimension_numbers = #tpu.dot_dimension_numbers<[1], [0], [0], [1], [0, 0, 1, 1], [], []>} : vector<2x128xf32>, vector<128x128xf32>, vector<2x128xf32> -> vector<2x128xf32>
    %c416 = arith.constant 416 : index
    %c0_34 = arith.constant 0 : index
    %324 = vector.load %arg2[%c416, %c0_34] : memref<600x128xf32, #tpu.memory_space<vmem>>, vector<1x128xf32>
    %325 = vector.broadcast %324 : vector<1x128xf32> to vector<2x128xf32>
    %326 = arith.addf %323, %325 : vector<2x128xf32>
    %327 = math.tanh %326 : vector<2x128xf32>
    %328 = arith.mulf %327, %15 : vector<2x128xf32>
    %c424 = arith.constant 424 : index
    %c0_35 = arith.constant 0 : index
    %329 = vector.load %arg2[%c424, %c0_35] : memref<600x128xf32, #tpu.memory_space<vmem>>, vector<128x128xf32>
    %cst_36 = arith.constant dense<0.000000e+00> : vector<2x128xf32>
    %330 = tpu.matmul %328, %329, %cst_36 {dimension_numbers = #tpu.dot_dimension_numbers<[1], [0], [0], [1], [0, 0, 1, 1], [], []>} : vector<2x128xf32>, vector<128x128xf32>, vector<2x128xf32> -> vector<2x128xf32>
    %c552 = arith.constant 552 : index
    %c0_37 = arith.constant 0 : index
    %331 = vector.load %arg2[%c552, %c0_37] : memref<600x128xf32, #tpu.memory_space<vmem>>, vector<1x128xf32>
    %332 = vector.broadcast %331 : vector<1x128xf32> to vector<2x128xf32>
    %333 = arith.addf %330, %332 : vector<2x128xf32>
    %334 = math.tanh %333 : vector<2x128xf32>
    %335 = vector.extract_strided_slice %334 {offsets = [0, 0], sizes = [2, 32], strides = [1, 1]} : vector<2x128xf32> to vector<2x32xf32>
    %c560 = arith.constant 560 : index
    %c0_38 = arith.constant 0 : index
    %336 = vector.load %arg2[%c560, %c0_38] : memref<600x128xf32, #tpu.memory_space<vmem>>, vector<32x128xf32>
    %cst_39 = arith.constant dense<0.000000e+00> : vector<2x128xf32>
    %337 = tpu.matmul %335, %336, %cst_39 {dimension_numbers = #tpu.dot_dimension_numbers<[1], [0], [0], [1], [0, 0, 1, 1], [], []>} : vector<2x32xf32>, vector<32x128xf32>, vector<2x128xf32> -> vector<2x128xf32>
    %c592 = arith.constant 592 : index
    %c0_40 = arith.constant 0 : index
    %338 = vector.load %arg2[%c592, %c0_40] : memref<600x128xf32, #tpu.memory_space<vmem>>, vector<1x128xf32>
    %339 = vector.broadcast %338 : vector<1x128xf32> to vector<2x128xf32>
    %340 = arith.addf %337, %339 : vector<2x128xf32>
    %341 = vector.extract_strided_slice %340 {offsets = [0, 0], sizes = [2, 32], strides = [1, 1]} : vector<2x128xf32> to vector<2x32xf32>
    %c0_41 = arith.constant 0 : index
    %c0_42 = arith.constant 0 : index
    %342 = vector.load %arg3[%c0_41, %c0_42] : memref<2x32xf32, #tpu.memory_space<vmem>>, vector<2x32xf32>
    tpu.vector_store %arg3[%c0_41, %c0_42], %341 {strides = array<i32>} : memref<2x32xf32, #tpu.memory_space<vmem>>, vector<2x32xf32>,
    return
  }
}

</mosaic_0001>

<bundles_post_ra>
// kernel: deeper_lstm_forward.1
= control target key start
LH: loop header
LB: loop body
LE: loop exit
PB: predicated region body
PF: predicated region fallthrough
CT: control target
= control target key end

     0   :  { %8 = vsyncpa [#allocation3], 0  ;;  %s3111_s0 = inlined_call_operand.hbm [shape: f32[2,64], index: 0, kind: input, shape index: {}]   ;;  %s3112_s1 = inlined_call_operand.hbm [shape: f32[2,8,32], index: 1, kind: input, shape index: {}]   ;;  %s3113_s2 = inlined_call_operand.hbm [shape: f32[600,128], index: 2, kind: input, shape index: {}]   ;;  %s3114_s3 = inlined_call_operand.hbm [shape: f32[2,32], index: 3, kind: output, shape index: {}]  }
   0x1   :  { %9 = vsyncpa [#allocation6], 0 }
   0x2   :  { %10 = vsyncpa [#allocation4], 0  ;;  %s2457_s12 = smov [#allocation5]  }
   0x3   :  { %s26_s13 = sshll.u32 %s2457_s12, 4  ;;  %s27_s13 = int_to_ptr.vmem [resolvable:$true] %s26_s13 }
   0x4   :  { %s2379_s14 = scalar_lea.vmem %s27_s13, 256  ;;  %p2384_p1 = scmp.lt.s32.totalorder %s27_s13, %s27_s13 }
   0x5   :  { %p2380_p0 = scmp.ne.s32.totalorder %s27_s13, %s2379_s14  ;;  %p2385_p2 = scmp.lt.s32.totalorder %s2379_s14, %s2379_s14 }
   0x7   :  { %p2386_p3 = por %p2385_p2, %p2384_p1 }
   0x9   :  { %p2387_p4 = pnand %p2386_p3, %p2380_p0 }
   0xb   :  { %2390 = shalt.err (!%p2387_p4)
}
   0xc   :  { %s2458_s15 = smov 128   ;;  %s2459_s16 = smov 8  }
   0xd   :  { %32 = dma.hbm_to_vmem [thread:$0]  %s3112_s1, 256, %s27_s13, [#allocation6], %s2458_s15, %s2458_s15, %s2459_s16  }
   0xe   :  { %s2460_s19 = smov [#allocation2]   ;;  %s2461_s21 = smov [#allocation7]  }
   0xf   :  { %s17_s20 = sshll.u32 %s2460_s19, 4  ;;  %s38_s22 = sshll.u32 %s2461_s21, 4  ;;  %s18_s20 = int_to_ptr.vmem [resolvable:$true] %s17_s20  ;;  %s39_s22 = int_to_ptr.vmem [resolvable:$true] %s38_s22 }
  0x10   :  { %s2399_s23 = scalar_lea.vmem %s18_s20, 32  ;;  %p2404_p6 = scmp.lt.s32.totalorder %s18_s20, %s18_s20 }
  0x11   :  { %p2400_p5 = scmp.ne.s32.totalorder %s18_s20, %s2399_s23  ;;  %p2405_p7 = scmp.lt.s32.totalorder %s2399_s23, %s2399_s23 }
  0x13   :  { %p2406_p8 = por %p2405_p7, %p2404_p6 }
  0x15   :  { %p2407_p9 = pnand %p2406_p8, %p2400_p5 }
  0x17   :  { %2410 = shalt.err (!%p2407_p9)
}
  0x18   :  { %20 = dma.hbm_to_vmem [thread:$0]  %s3111_s0, 32, %s18_s20, [#allocation3]  }
  0x19   :  { %s2419_s26 = scalar_lea.vmem %s39_s22, 9600  ;;  %p2424_p11 = scmp.lt.s32.totalorder %s39_s22, %s39_s22 }
  0x1a   :  { %p2420_p10 = scmp.ne.s32.totalorder %s39_s22, %s2419_s26  ;;  %p2425_p12 = scmp.lt.s32.totalorder %s2419_s26, %s2419_s26 }
  0x1c   :  { %p2426_p13 = por %p2425_p12, %p2424_p11 }
  0x1e   :  { %p2427_p0 = pnand %p2426_p13, %p2420_p10 }
  0x20   :  { %2430 = shalt.err (!%p2427_p0)
}
  0x21   :  { %44 = dma.hbm_to_vmem [thread:$0]  %s3113_s2, 9600, %s39_s22, [#allocation6], %s2458_s15, %s2458_s15, %s2459_s16  }
  0x22   :  { %2451 = dma.done.wait [#allocation3], 32  }
  0x23   :  { %2452 = vsyncadd [#allocation3], 4294967264 }
  0x24   :  { %2453 = dma.done.wait [#allocation6], 9856  }
  0x25   :  { %2454 = vsyncadd [#allocation6], 4294957440  ;;  %vm172_vm0 = vcmask 261120   ;;  %v166_v0 = vld [vmem:[#allocation7 + $0x60] sm:$0xff]  ;;  %v165_v1 = vld [vmem:[#allocation7 + $0x58] sm:$0xff]  ;;  %v2462_v17 = vmov 0.0  }
  0x26   :  { %2133 = vmatprep.subr.mxu1 %v166_v0  ;;  %v161_v2 = vld [vmem:[#allocation5] sm:$0xff]  ;;  %v163_v4 = vld [vmem:[#allocation7 + $0x48] sm:$0xff]  ;;  %v162_v5 = vld [vmem:[#allocation5 + $0x8] sm:$0xff]  ;;  %2114 = vmatprep.subr.mxu0 %v2462_v17  ;;  %vm56_vm1 = vcmask 517120   ;;  %vm86_vm2 = vcmask 523264   ;;  %v2463_v21 = vmov 1.0  }
  0x27   :  { %2134 = vmatpush3.msra.mxu1 %v166_v0  ;;  %v164_v3 = vld [vmem:[#allocation7 + $0x50] sm:$0xff]  ;;  %2141 = vmatprep.mubr.msk.f32.mxu1 %vm172_vm0, %v161_v2  ;;  %v259_v6 = vld [vmem:[#allocation7 + $0x88] sm:$0xff]  ;;  %v258_v7 = vld [vmem:[#allocation7 + $0x80] sm:$0xff]  ;;  %v363_v22 = vsel %vm86_vm2, 0.5, %v2463_v21  ;;  %vm364_vm3 = vcmask 785408   ;;  %v366_v32 = vsel %vm86_vm2, 0.5, %v2462_v17 }
  0x28   :  { %2135 = vmatprep.subr.mxu1 %v165_v1  ;;  %v257_v8 = vld [vmem:[#allocation7 + $0x78] sm:$0xff]  ;;  %v256_v9 = vld [vmem:[#allocation7 + $0x70] sm:$0xff]  ;;  %v2035_v10 = vld [vmem:[#allocation7 + $0x68] ss:$0 sm:$0xff]  ;;  %v2510_v23 = vsel %vm364_vm3, %v363_v22, 0.5  ;;  %v2526_v33 = vsel %vm364_vm3, %v366_v32, 0.5 }
  0x29   :  { %2136 = vmatpush3.msra.mxu1 %v165_v1  ;;  %v2504_v18 = vld [vmem:[#allocation2] sm:$0x3]  ;;  %v2038_v24 = vld [vmem:[#allocation7 + $0x90] ss:$0 sm:$0xff]  ;;  %v2513_v25 = vrot.slane %v2510_v23, 1  ;;  %v379_v34 = vrot.slane %v2526_v33, 1 }
  0x2a   :  { %2137 = vmatprep.subr.mxu1 %v164_v3  ;;  %v55_v19 = vmul.f32 %v2504_v18, %v2504_v18  ;;  %s2464_s0 = smov 64   ;;  %s2465_s2 = smov 32   ;;  %v80_v52 = vld [vmem:[#allocation7 + $0x38] sm:$0xff]  ;;  %v79_v53 = vld [vmem:[#allocation7 + $0x30] sm:$0xff]  ;;  %vm2466_vm4 = vmmov 0   ;;  %v78_v54 = vld [vmem:[#allocation7 + $0x28] sm:$0xff] }
  0x2b   :  { %2138 = vmatpush3.msra.mxu1 %v164_v3  ;;  %2115 = vmatpush3.msra.mxu0 %v80_v52  ;;  %v77_v55 = vld [vmem:[#allocation7 + $0x20] sm:$0xff]  ;;  %v76_v56 = vld [vmem:[#allocation7 + $0x18] sm:$0xff]  ;;  %v75_v57 = vld [vmem:[#allocation7 + $0x10] sm:$0xff]  ;;  %s2467_s29 = smov 1e-24   ;;  %vm421_vm5 = vcmask 1041409  }
  0x2c   :  { %2139 = vmatprep.subr.mxu1 %v163_v4  ;;  %v57_v20 = vsel %vm56_vm1, %v55_v19, 0.0  ;;  %2130 = vmatprep.mubr.msk.f32.mxu0 %vm2466_vm4, %v2462_v17  ;;  %v74_v58 = vld [vmem:[#allocation7 + $0x8] sm:$0xff]  ;;  %v73_v59 = vld [vmem:[#allocation7] sm:$0xff]  ;;  %vm588_vm6 = vcmask 1042434   ;;  %vm758_vm7 = vcmask 1043459   ;;  %vm928_vm8 = vcmask 1044484  }
  0x2d   :  { %2140 = vmatpush3.msra.mxu1 %v163_v4  ;;  %58 = vadd.xlane.f32.xlu1 %v57_v20  ;;  %v2605_v20 = vld [vmem:[#allocation7 + $0xa8] sm:$0xff]  ;;  %v2610_v21 = vld [vmem:[#allocation7 + $0xe0] sm:$0xff]  ;;  %vm1098_vm9 = vcmask 1045509   ;;  %vm1268_vm10 = vcmask 1046534   ;;  %vm1438_vm11 = vcmask 1047559   ;;  %vm1619_vm12 = vcmask 1040384  }
  0x2e   :  { %2142 = vmatmul.mubr.msk.f32.vlgmr.msra.gmra.mxu1 %vm172_vm0, %v162_v5  ;;  %2144 = vmatprep.subr.mxu1 %v259_v6  ;;  %v2613_v22 = vld [vmem:[#allocation7 + $0xa0] sm:$0xff]  ;;  %s2468_s5 = smov [#allocation8]   ;;  %vm2015_vm13 = vcmask 254976  }
  0x2f   :  { %2145 = vmatpush3.msra.mxu1 %v259_v6  ;;  %2116 = vmatprep.subr.mxu0 %v2462_v17  ;;  %v2566_v6 = vld [vmem:[#allocation7 + $0x110] sm:$0xff]  ;;  %s2023_s6 = sshll.u32 %s2468_s5, 4  ;;  %s2024_s6 = int_to_ptr.vmem [resolvable:$true] %s2023_s6 }
  0x30   :  { %2146 = vmatprep.subr.mxu1 %v258_v7  ;;  %2117 = vmatpush3.msra.mxu0 %v79_v53  ;;  %s2431_s7 = scalar_lea.vmem %s2024_s6, 32  ;;  %p2436_p2 = scmp.lt.s32.totalorder %s2024_s6, %s2024_s6 }
  0x31   :  { %2147 = vmatpush3.msra.mxu1 %v258_v7  ;;  %2118 = vmatprep.subr.mxu0 %v2462_v17  ;;  %v2568_v7 = vld [vmem:[#allocation7 + $0xd0] sm:$0xff]  ;;  %p2432_p1 = scmp.ne.s32.totalorder %s2024_s6, %s2431_s7  ;;  %p2437_p3 = scmp.lt.s32.totalorder %s2431_s7, %s2431_s7 }
  0x32   :  { %2148 = vmatprep.subr.mxu1 %v257_v8  ;;  %2119 = vmatpush3.msra.mxu0 %v78_v54 }
  0x33   :  { %2149 = vmatpush3.msra.mxu1 %v257_v8  ;;  %2120 = vmatprep.subr.mxu0 %v2462_v17  ;;  %v2570_v8 = vld [vmem:[#allocation7 + $0x108] sm:$0xff]  ;;  %p2438_p4 = por %p2437_p3, %p2436_p2 }
  0x34   :  { %2150 = vmatprep.subr.mxu1 %v256_v9  ;;  %2121 = vmatpush3.msra.mxu0 %v77_v55 }
  0x35   :  { %2151 = vmatpush3.msra.mxu1 %v256_v9  ;;  %2122 = vmatprep.subr.mxu0 %v2462_v17  ;;  %v2573_v9 = vld [vmem:[#allocation7 + $0xc8] sm:$0xff]  ;;  %p2439_p5 = pnand %p2438_p4, %p2432_p1 }
  0x36   :  { %2123 = vmatpush3.msra.mxu0 %v76_v56  ;;  %619 = vmatprep.subr.mxu1 %v2566_v6 }
  0x37   :  { %2124 = vmatprep.subr.mxu0 %v2462_v17 }
  0x38   :  { %2125 = vmatpush3.msra.mxu0 %v75_v57 }
  0x39   :  { %2126 = vmatprep.subr.mxu0 %v2462_v17 }
  0x3a   :  { %2127 = vmatpush3.msra.mxu0 %v74_v58  ;;  %v541_v58 = vrot.slane %v2526_v33, 7 }
  0x3b   :  { %2128 = vmatprep.subr.mxu0 %v2462_v17 }
  0x3c   :  { %2129 = vmatpush3.msra.mxu0 %v73_v59 }
  0x3d   :  { %446 = vmatprep.subr.mxu0 %v2566_v6 }
  0xb6   :  { %v59_v41 = vpop.xlane.xlu1 %58 }
  0xb7   :  { %v60_v42 = vrot.slane %v59_v41, 4 }
  0xb9   :  { %v61_v43 = vadd.f32 %v60_v42, %v59_v41 }
  0xbb   :  { %v62_v44 = vrot.slane %v61_v43, 2 }
  0xbd   :  { %v63_v45 = vadd.f32 %v62_v44, %v61_v43 }
  0xbf   :  { %v64_v46 = vrot.slane %v63_v45, 1 }
  0xc1   :  { %v65_v47 = vadd.f32 %v64_v46, %v63_v45  ;;  %v2662_v45 = vrot.slane %v2510_v23, 7 }
  0xc3   :  { %2236 = vpush %v65_v47 }
  0xee   :  { %v2143_v11 = vpop.f32.mrf.mxu1 }
  0xef   :  { %v251_v12 = vadd.f32 %v2143_v11, %v2035_v10  ;;  %v2581_v11 = vld [vmem:[#allocation7 + $0xc0] sm:$0xff] }
  0xf0   :  { %v245_v13 = vpop.f32.mrf.mxu1 }
  0xf1   :  { %v246_v14 = vadd.f32 %v2035_v10, %v245_v13  ;;  %v2577_v10 = vld [vmem:[#allocation7 + $0x100] sm:$0xff] }
  0xf3   :  { %2257 = vtanh.f32 %v246_v14  ;;  %v2589_v14 = vld [vmem:[#allocation7 + $0xb8] sm:$0xff] }
  0xf4   :  { %2259 = vtanh.f32 %v251_v12  ;;  %s2237_s28 = spop %2236  ;;  %v2585_v12 = vld [vmem:[#allocation7 + $0xf8] sm:$0xff] }
  0xf5   :  { %s67_s30 = smax.f32 %s2467_s29, %s2237_s28 }
  0xf6   :  { %v68_v60 = vstv %s67_s30 }
 0x100   :  { %v2258_v15 = vpop.eup %2257 }
 0x101   :  { %v2260_v16 = vpop.eup %2259  ;;  %2152 = vmatprep.mubr.msk.f32.mxu1 %vm172_vm0, %v2258_v15  ;;  %v2594_v15 = vld [vmem:[#allocation7 + $0xf0] sm:$0xff] }
 0x102   :  { %2153 = vmatmul.mubr.msk.f32.vlgmr.msra.gmra.mxu1 %vm172_vm0, %v2260_v16  ;;  %v2597_v16 = vld [vmem:[#allocation7 + $0xb0] sm:$0xff] }
 0x103   :  { %667 = vmatprep.mubr.f32.mxu1 %v2462_v17  ;;  %620 = vmatpush1.msra.mxu1 %v2568_v7 }
 0x104   :  { %621 = vmatprep.subr.mxu1 %v2570_v8 }
 0x105   :  { %622 = vmatpush1.msra.mxu1 %v2573_v9 }
 0x106   :  { %623 = vmatprep.subr.mxu1 %v2577_v10 }
 0x107   :  { %624 = vmatpush1.msra.mxu1 %v2581_v11 }
 0x108   :  { %625 = vmatprep.subr.mxu1 %v2585_v12 }
 0x109   :  { %626 = vmatpush1.msra.mxu1 %v2589_v14 }
 0x10a   :  { %627 = vmatprep.subr.mxu1 %v2594_v15 }
 0x10b   :  { %628 = vmatpush1.msra.mxu1 %v2597_v16 }
 0x1c2   :  { %v2154_v26 = vpop.f32.mrf.mxu1 }
 0x1c3   :  { %v2515_v27 = vadd.f32 %v2154_v26, %v2038_v24  ;;  %v2628_v26 = vld [vmem:[#allocation7 + $0x98] sm:$0xff] }
 0x1c4   :  { %v337_v28 = vpop.f32.mrf.mxu1 }
 0x1c5   :  { %v2517_v29 = vadd.f32 %v2038_v24, %v337_v28  ;;  %v373_v30 = vmul.f32 %v2513_v25, %v2515_v27  ;;  %v2617_v24 = vld [vmem:[#allocation7 + $0xd8] sm:$0xff] }
 0x1c7   :  { %2261 = vtanh.f32 %v373_v30  ;;  %v372_v31 = vmul.f32 %v2510_v23, %v2517_v29 }
 0x1c9   :  { %2263 = vtanh.f32 %v372_v31 }
 0x1ca   :  { %2265 = vrsqrt.f32 %v68_v60 }
 0x1d4   :  { %v2262_v35 = vpop.eup %2261 }
 0x1d5   :  { %v377_v36 = vmul.f32 %v2262_v35, %v2513_v25 }
 0x1d6   :  { %v2264_v37 = vpop.eup %2263 }
 0x1d7   :  { %v2532_v38 = vadd.f32 %v379_v34, %v377_v36  ;;  %v376_v39 = vmul.f32 %v2264_v37, %v2510_v23  ;;  %v2266_v61 = vpop.eup %2265 }
 0x1d8   :  { %2238 = vpush %v2266_v61 }
 0x1d9   :  { %390 = vrot.lane.b32.xlu0 %v2532_v38, %s2464_s0  ;;  %v2538_v40 = vadd.f32 %v376_v39, %v2526_v33  ;;  %v385_v0 = vmul.f32 0.0, %v2532_v38 }
 0x1db   :  { %v384_v3 = vmul.f32 0.0, %v2538_v40 }
 0x1dd   :  { %388 = vrot.lane.b32.xlu0 %v2538_v40, %s2464_s0 }
 0x209   :  { %s2239_s4 = spop %2238 }
 0x20a   :  { %v71_v62 = vstv %s2239_s4 }
 0x20b   :  { %v72_v63 = vmul.f32 %v71_v62, %v2504_v18  ;;  %v2601_v18 = vld [vmem:[#allocation7 + $0xe8] sm:$0xff] }
 0x20c   :  { %629 = vmatprep.subr.mxu1 %v2601_v18 }
 0x20d   :  { %2131 = vmatmul.mubr.msk.f32.vlgmr.msra.gmra.mxu0 %vm86_vm2, %v72_v63  ;;  %630 = vmatpush1.msra.mxu1 %v2605_v20 }
 0x20e   :  { %494 = vmatprep.mubr.f32.mxu0 %v2462_v17  ;;  %447 = vmatpush1.msra.mxu0 %v2568_v7 }
 0x20f   :  { %448 = vmatprep.subr.mxu0 %v2570_v8  ;;  %631 = vmatprep.subr.mxu1 %v2610_v21 }
 0x210   :  { %449 = vmatpush1.msra.mxu0 %v2573_v9  ;;  %632 = vmatpush1.msra.mxu1 %v2613_v22 }
 0x211   :  { %450 = vmatprep.subr.mxu0 %v2577_v10  ;;  %633 = vmatprep.subr.mxu1 %v2617_v24 }
 0x212   :  { %451 = vmatpush1.msra.mxu0 %v2581_v11  ;;  %634 = vmatpush1.msra.mxu1 %v2628_v26 }
 0x213   :  { %452 = vmatprep.subr.mxu0 %v2585_v12  ;;  %959 = vmatprep.subr.mxu1 %v2566_v6 }
 0x214   :  { %453 = vmatpush1.msra.mxu0 %v2589_v14 }
 0x215   :  { %454 = vmatprep.subr.mxu0 %v2594_v15 }
 0x216   :  { %455 = vmatpush1.msra.mxu0 %v2597_v16 }
 0x217   :  { %456 = vmatprep.subr.mxu0 %v2601_v18 }
 0x218   :  { %457 = vmatpush1.msra.mxu0 %v2605_v20 }
 0x219   :  { %458 = vmatprep.subr.mxu0 %v2610_v21 }
 0x21a   :  { %459 = vmatpush1.msra.mxu0 %v2613_v22 }
 0x21b   :  { %460 = vmatprep.subr.mxu0 %v2617_v24 }
 0x21c   :  { %461 = vmatpush1.msra.mxu0 %v2628_v26 }
 0x21d   :  { %789 = vmatprep.subr.mxu0 %v2566_v6 }
 0x24b   :  { %v391_v48 = vpop.permute.xlu0 %390 }
 0x24c   :  { %v395_v49 = vmul.f32 %v391_v48, %v2532_v38 }
 0x24e   :  { %400 = vrot.lane.b32.xlu1 %v395_v49, %s2465_s2 }
 0x24f   :  { %v389_v50 = vpop.permute.xlu0 %388 }
 0x250   :  { %v394_v51 = vmul.f32 %v389_v50, %v2538_v40 }
 0x252   :  { %398 = vrot.lane.b32.xlu0 %v394_v51, %s2465_s2 }
 0x2c0   :  { %v401_v1 = vpop.permute.xlu1 %400 }
 0x2c1   :  { %v2559_v2 = vadd.f32 %v401_v1, %v385_v0 }
 0x2c3   :  { %2267 = vtanh.f32 %v2559_v2 }
 0x2c4   :  { %v399_v4 = vpop.permute.xlu0 %398 }
 0x2c5   :  { %v2563_v5 = vadd.f32 %v399_v4, %v384_v3 }
 0x2c7   :  { %2269 = vtanh.f32 %v2563_v5 }
 0x2cd   :  { %v2637_v37 = vpop.f32.mrf.mxu0 }
 0x2cf   :  { %v2132_v39 = vpop.f32.mrf.mxu0 }
 0x2d0   :  { %v2268_v13 = vpop.eup %2267 }
 0x2d1   :  { %412 = vrot.lane.b32.xlu0 %v2268_v13, %s2464_s0  ;;  %v548_v13 = vrot.slane %v2559_v2, 7 }
 0x2d4   :  { %v2270_v19 = vpop.eup %2269 }
 0x2d5   :  { %410 = vrot.lane.b32.xlu0 %v2270_v19, %s2464_s0 }
 0x343   :  { %v413_v28 = vpop.permute.xlu0 %412 }
 0x344   :  { %v417_v30 = vmul.f32 %v413_v28, %v2532_v38 }
 0x346   :  { %v420_v32 = vrot.slane %v417_v30, 7  ;;  %v547_v30 = vrot.slane %v2563_v5, 7 }
 0x347   :  { %v411_v31 = vpop.permute.xlu0 %410 }
 0x348   :  { %v416_v35 = vmul.f32 %v411_v31, %v2538_v40  ;;  %v2658_v40 = vld [vmem:[#allocation7 + $0x118] ss:$0 sm:$0xff] }
 0x34a   :  { %v422_v36 = vsel %vm421_vm5, %v420_v32, %v416_v35 }
 0x34b   :  { %423 = vrot.lane.b32.xlu0 %v422_v36, %s2465_s2 }
 0x3bd   :  { %v424_v41 = vpop.permute.xlu0 %423 }
 0x3be   :  { %v426_v42 = vsel %vm172_vm0, %v424_v41, 0.0 }
 0x3bf   :  { %2041 = vmatmul.mubr.msk.f32.vlgmr.msra.gmra.mxu0 %vm86_vm2, %v426_v42 }
 0x3c0   :  { %790 = vmatpush1.msra.mxu0 %v2568_v7  ;;  %837 = vmatprep.mubr.f32.mxu0 %v2462_v17 }
 0x3c1   :  { %791 = vmatprep.subr.mxu0 %v2570_v8 }
 0x3c2   :  { %792 = vmatpush1.msra.mxu0 %v2573_v9 }
 0x3c3   :  { %793 = vmatprep.subr.mxu0 %v2577_v10 }
 0x3c4   :  { %794 = vmatpush1.msra.mxu0 %v2581_v11 }
 0x3c5   :  { %795 = vmatprep.subr.mxu0 %v2585_v12 }
 0x3c6   :  { %796 = vmatpush1.msra.mxu0 %v2589_v14 }
 0x3c7   :  { %797 = vmatprep.subr.mxu0 %v2594_v15 }
 0x3c8   :  { %798 = vmatpush1.msra.mxu0 %v2597_v16 }
 0x3c9   :  { %799 = vmatprep.subr.mxu0 %v2601_v18 }
 0x3ca   :  { %800 = vmatpush1.msra.mxu0 %v2605_v20 }
 0x3cb   :  { %801 = vmatprep.subr.mxu0 %v2610_v21 }
 0x3cc   :  { %802 = vmatpush1.msra.mxu0 %v2613_v22 }
 0x3cd   :  { %803 = vmatprep.subr.mxu0 %v2617_v24 }
 0x3ce   :  { %804 = vmatpush1.msra.mxu0 %v2628_v26 }
 0x3cf   :  { %1129 = vmatprep.subr.mxu0 %v2566_v6 }
 0x47f   :  { %v496_v38 = vpop.f32.mrf.mxu0 }
 0x480   :  { %v528_v43 = vrot.slane %v496_v38, 7  ;;  %v532_v44 = vadd.f32 %v496_v38, %v2515_v27 }
 0x481   :  { %v498_v46 = vpop.f32.mrf.mxu0 }
 0x482   :  { %v531_v47 = vadd.f32 %v528_v43, %v2517_v29  ;;  %v536_v48 = vmul.f32 %v532_v44, %v2510_v23  ;;  %v505_v49 = vadd.f32 %v2658_v40, %v498_v46 }
 0x484   :  { %v535_v50 = vmul.f32 %v2662_v45, %v531_v47  ;;  %2271 = vtanh.f32 %v536_v48  ;;  %v506_v51 = vmul.f32 %v505_v49, %v2510_v23 }
 0x486   :  { %2273 = vtanh.f32 %v535_v50 }
 0x487   :  { %2275 = vtanh.f32 %v506_v51 }
 0x491   :  { %v2272_v52 = vpop.eup %2271 }
 0x492   :  { %v540_v53 = vmul.f32 %v2272_v52, %v2510_v23 }
 0x493   :  { %v2274_v54 = vpop.eup %2273 }
 0x494   :  { %v2276_v55 = vpop.eup %2275  ;;  %v544_v56 = vadd.f32 %v540_v53, %v2526_v33  ;;  %v539_v57 = vmul.f32 %v2274_v54, %v2662_v45 }
 0x495   :  { %v508_v59 = vmul.f32 %v2276_v55, %v2510_v23 }
 0x496   :  { %557 = vrot.lane.b32.xlu1 %v544_v56, %s2464_s0  ;;  %v543_v61 = vadd.f32 %v541_v58, %v539_v57  ;;  %v552_v19 = vmul.f32 %v548_v13, %v544_v56 }
 0x497   :  { %v509_v60 = vadd.f32 %v508_v59, %v2526_v33 }
 0x498   :  { %v551_v36 = vmul.f32 %v547_v30, %v543_v61 }
 0x499   :  { %512 = vrot.lane.b32.xlu0 %v509_v60, %s2464_s0  ;;  %v510_v32 = vmul.f32 0.0, %v509_v60 }
 0x49a   :  { %555 = vrot.lane.b32.xlu1 %v543_v61, %s2464_s0 }
 0x508   :  { %v558_v62 = vpop.permute.xlu1 %557 }
 0x509   :  { %v562_v63 = vmul.f32 %v558_v62, %v544_v56 }
 0x50b   :  { %v513_v0 = vpop.permute.xlu0 %512  ;;  %567 = vrot.lane.b32.xlu0 %v562_v63, %s2465_s2 }
 0x50c   :  { %v515_v1 = vmul.f32 %v513_v0, %v509_v60  ;;  %v556_v3 = vpop.permute.xlu1 %555 }
 0x50d   :  { %v561_v4 = vmul.f32 %v556_v3, %v543_v61 }
 0x50e   :  { %517 = vrot.lane.b32.xlu1 %v515_v1, %s2465_s2 }
 0x50f   :  { %565 = vrot.lane.b32.xlu0 %v561_v4, %s2465_s2 }
 0x57d   :  { %v568_v28 = vpop.permute.xlu0 %567 }
 0x57e   :  { %v2685_v31 = vadd.f32 %v568_v28, %v552_v19 }
 0x580   :  { %2277 = vtanh.f32 %v2685_v31  ;;  %v518_v35 = vpop.permute.xlu1 %517 }
 0x581   :  { %v2688_v39 = vadd.f32 %v518_v35, %v510_v32  ;;  %v566_v41 = vpop.permute.xlu0 %565 }
 0x582   :  { %v2690_v42 = vadd.f32 %v566_v41, %v551_v36 }
 0x583   :  { %2279 = vtanh.f32 %v2688_v39 }
 0x584   :  { %2281 = vtanh.f32 %v2690_v42 }
 0x58d   :  { %v2278_v2 = vpop.eup %2277 }
 0x58e   :  { %579 = vrot.lane.b32.xlu1 %v2278_v2, %s2464_s0  ;;  %v711_v2 = vrot.slane %v2526_v33, 6 }
 0x590   :  { %v2280_v5 = vpop.eup %2279 }
 0x591   :  { %v2282_v38 = vpop.eup %2281  ;;  %523 = vrot.lane.b32.xlu0 %v2280_v5, %s2464_s0 }
 0x592   :  { %577 = vrot.lane.b32.xlu1 %v2282_v38, %s2464_s0 }
 0x600   :  { %v580_v43 = vpop.permute.xlu1 %579 }
 0x601   :  { %v584_v44 = vmul.f32 %v580_v43, %v544_v56 }
 0x603   :  { %v524_v46 = vpop.permute.xlu0 %523  ;;  %v587_v49 = vrot.slane %v584_v44, 7 }
 0x604   :  { %v526_v47 = vmul.f32 %v524_v46, %v509_v60  ;;  %v578_v48 = vpop.permute.xlu1 %577 }
 0x605   :  { %v583_v50 = vmul.f32 %v578_v48, %v543_v61  ;;  %v2719_v61 = vrot.slane %v2510_v23, 6  ;;  %v718_v48 = vrot.slane %v2685_v31, 7 }
 0x606   :  { %v594_v51 = vrot.slane %v526_v47, 7 }
 0x607   :  { %v589_v52 = vsel %vm588_vm6, %v587_v49, %v583_v50 }
 0x608   :  { %595 = vrot.lane.b32.xlu1 %v594_v51, %s2464_s0  ;;  %590 = vrot.lane.b32.xlu0 %v589_v52, %s2465_s2  ;;  %v717_v52 = vrot.slane %v2690_v42, 7 }
 0x67a   :  { %v596_v53 = vpop.permute.xlu1 %595  ;;  %v591_v54 = vpop.permute.xlu0 %590 }
 0x67b   :  { %v598_v55 = vsel %vm172_vm0, %v591_v54, %v596_v53 }
 0x67c   :  { %v600_v57 = vrot.slane %v598_v55, 1 }
 0x67e   :  { %2043 = vmatmul.mubr.msk.f32.vlgmr.msra.gmra.mxu1 %vm86_vm2, %v600_v57 }
 0x67f   :  { %960 = vmatpush1.msra.mxu1 %v2568_v7  ;;  %1007 = vmatprep.mubr.f32.mxu1 %v2462_v17 }
 0x680   :  { %961 = vmatprep.subr.mxu1 %v2570_v8 }
 0x681   :  { %962 = vmatpush1.msra.mxu1 %v2573_v9 }
 0x682   :  { %963 = vmatprep.subr.mxu1 %v2577_v10 }
 0x683   :  { %964 = vmatpush1.msra.mxu1 %v2581_v11 }
 0x684   :  { %965 = vmatprep.subr.mxu1 %v2585_v12 }
 0x685   :  { %966 = vmatpush1.msra.mxu1 %v2589_v14 }
 0x686   :  { %967 = vmatprep.subr.mxu1 %v2594_v15 }
 0x687   :  { %968 = vmatpush1.msra.mxu1 %v2597_v16 }
 0x688   :  { %969 = vmatprep.subr.mxu1 %v2601_v18 }
 0x689   :  { %970 = vmatpush1.msra.mxu1 %v2605_v20 }
 0x68a   :  { %971 = vmatprep.subr.mxu1 %v2610_v21 }
 0x68b   :  { %972 = vmatpush1.msra.mxu1 %v2613_v22 }
 0x68c   :  { %973 = vmatprep.subr.mxu1 %v2617_v24 }
 0x68d   :  { %974 = vmatpush1.msra.mxu1 %v2628_v26 }
 0x68e   :  { %1299 = vmatprep.subr.mxu1 %v2566_v6 }
 0x73e   :  { %v669_v56 = vpop.f32.mrf.mxu1 }
 0x73f   :  { %v697_v59 = vrot.slane %v669_v56, 6  ;;  %v698_v60 = vrot.slane %v669_v56, 7 }
 0x740   :  { %v671_v62 = vpop.f32.mrf.mxu1 }
 0x741   :  { %v701_v63 = vadd.f32 %v697_v59, %v2517_v29  ;;  %v702_v0 = vadd.f32 %v698_v60, %v2515_v27  ;;  %v674_v1 = vadd.f32 %v2658_v40, %v671_v62 }
 0x743   :  { %v705_v3 = vmul.f32 %v2719_v61, %v701_v63  ;;  %v706_v4 = vmul.f32 %v702_v0, %v2662_v45  ;;  %v675_v13 = vmul.f32 %v674_v1, %v2510_v23 }
 0x745   :  { %2283 = vtanh.f32 %v705_v3 }
 0x746   :  { %2285 = vtanh.f32 %v706_v4 }
 0x747   :  { %2287 = vtanh.f32 %v675_v13 }
 0x752   :  { %v2284_v19 = vpop.eup %2283 }
 0x753   :  { %v2286_v28 = vpop.eup %2285  ;;  %v709_v41 = vmul.f32 %v2284_v19, %v2719_v61 }
 0x754   :  { %v2288_v30 = vpop.eup %2287  ;;  %v710_v32 = vmul.f32 %v2286_v28, %v2662_v45 }
 0x755   :  { %v677_v35 = vmul.f32 %v2288_v30, %v2510_v23  ;;  %v713_v38 = vadd.f32 %v711_v2, %v709_v41 }
 0x756   :  { %v714_v36 = vadd.f32 %v710_v32, %v541_v58 }
 0x757   :  { %v678_v5 = vadd.f32 %v677_v35, %v2526_v33  ;;  %v721_v57 = vmul.f32 %v717_v52, %v713_v38 }
 0x758   :  { %727 = vrot.lane.b32.xlu0 %v714_v36, %s2464_s0  ;;  %v722_v49 = vmul.f32 %v718_v48, %v714_v36 }
 0x759   :  { %681 = vrot.lane.b32.xlu1 %v678_v5, %s2464_s0  ;;  %v679_v50 = vmul.f32 %v678_v5, %v2688_v39 }
 0x75c   :  { %725 = vrot.lane.b32.xlu0 %v713_v38, %s2464_s0 }
 0x7ca   :  { %v728_v45 = vpop.permute.xlu0 %727 }
 0x7cb   :  { %v732_v43 = vmul.f32 %v728_v45, %v714_v36  ;;  %v682_v44 = vpop.permute.xlu1 %681 }
 0x7cc   :  { %v684_v46 = vmul.f32 %v682_v44, %v678_v5 }
 0x7cd   :  { %737 = vrot.lane.b32.xlu1 %v732_v43, %s2465_s2 }
 0x7ce   :  { %686 = vrot.lane.b32.xlu0 %v684_v46, %s2465_s2  ;;  %v726_v58 = vpop.permute.xlu0 %725 }
 0x7cf   :  { %v731_v47 = vmul.f32 %v726_v58, %v713_v38 }
 0x7d1   :  { %735 = vrot.lane.b32.xlu1 %v731_v47, %s2465_s2 }
 0x83f   :  { %v738_v51 = vpop.permute.xlu1 %737 }
 0x840   :  { %v687_v53 = vpop.permute.xlu0 %686  ;;  %v2745_v54 = vadd.f32 %v738_v51, %v722_v49 }
 0x841   :  { %v2747_v55 = vadd.f32 %v687_v53, %v679_v50 }
 0x842   :  { %2289 = vtanh.f32 %v2745_v54 }
 0x843   :  { %2291 = vtanh.f32 %v2747_v55  ;;  %v736_v56 = vpop.permute.xlu1 %735 }
 0x844   :  { %v2751_v59 = vadd.f32 %v736_v56, %v721_v57 }
 0x846   :  { %2293 = vtanh.f32 %v2751_v59 }
 0x84f   :  { %v2290_v31 = vpop.eup %2289 }
 0x850   :  { %v2292_v39 = vpop.eup %2291  ;;  %749 = vrot.lane.b32.xlu0 %v2290_v31, %s2464_s0  ;;  %v881_v31 = vrot.slane %v2526_v33, 5 }
 0x851   :  { %692 = vrot.lane.b32.xlu1 %v2292_v39, %s2464_s0 }
 0x853   :  { %v2294_v42 = vpop.eup %2293 }
 0x854   :  { %747 = vrot.lane.b32.xlu0 %v2294_v42, %s2464_s0 }
 0x8c2   :  { %v750_v60 = vpop.permute.xlu0 %749 }
 0x8c3   :  { %v754_v62 = vmul.f32 %v750_v60, %v714_v36  ;;  %v693_v63 = vpop.permute.xlu1 %692 }
 0x8c4   :  { %v695_v0 = vmul.f32 %v693_v63, %v678_v5 }
 0x8c5   :  { %v757_v4 = vrot.slane %v754_v62, 7 }
 0x8c6   :  { %v764_v1 = vrot.slane %v695_v0, 6  ;;  %v748_v3 = vpop.permute.xlu0 %747 }
 0x8c7   :  { %v753_v13 = vmul.f32 %v748_v3, %v713_v38  ;;  %v2779_v38 = vrot.slane %v2510_v23, 5 }
 0x8c8   :  { %765 = vrot.lane.b32.xlu0 %v764_v1, %s2464_s0  ;;  %v888_v1 = vrot.slane %v2745_v54, 7 }
 0x8c9   :  { %v759_v19 = vsel %vm758_vm7, %v757_v4, %v753_v13 }
 0x8ca   :  { %760 = vrot.lane.b32.xlu1 %v759_v19, %s2465_s2  ;;  %v887_v19 = vrot.slane %v2751_v59, 7 }
 0x93a   :  { %v766_v28 = vpop.permute.xlu0 %765 }
 0x93c   :  { %v761_v30 = vpop.permute.xlu1 %760 }
 0x93d   :  { %v768_v32 = vsel %vm172_vm0, %v761_v30, %v766_v28 }
 0x93e   :  { %v770_v35 = vrot.slane %v768_v32, 2 }
 0x940   :  { %2044 = vmatmul.mubr.msk.f32.vlgmr.msra.gmra.mxu0 %vm86_vm2, %v770_v35 }
 0x941   :  { %1130 = vmatpush1.msra.mxu0 %v2568_v7  ;;  %1177 = vmatprep.mubr.f32.mxu0 %v2462_v17 }
 0x942   :  { %1131 = vmatprep.subr.mxu0 %v2570_v8 }
 0x943   :  { %1132 = vmatpush1.msra.mxu0 %v2573_v9 }
 0x944   :  { %1133 = vmatprep.subr.mxu0 %v2577_v10 }
 0x945   :  { %1134 = vmatpush1.msra.mxu0 %v2581_v11 }
 0x946   :  { %1135 = vmatprep.subr.mxu0 %v2585_v12 }
 0x947   :  { %1136 = vmatpush1.msra.mxu0 %v2589_v14 }
 0x948   :  { %1137 = vmatprep.subr.mxu0 %v2594_v15 }
 0x949   :  { %1138 = vmatpush1.msra.mxu0 %v2597_v16 }
 0x94a   :  { %1139 = vmatprep.subr.mxu0 %v2601_v18 }
 0x94b   :  { %1140 = vmatpush1.msra.mxu0 %v2605_v20 }
 0x94c   :  { %1141 = vmatprep.subr.mxu0 %v2610_v21 }
 0x94d   :  { %1142 = vmatpush1.msra.mxu0 %v2613_v22 }
 0x94e   :  { %1143 = vmatprep.subr.mxu0 %v2617_v24 }
 0x94f   :  { %1144 = vmatpush1.msra.mxu0 %v2628_v26 }
 0x950   :  { %1469 = vmatprep.subr.mxu0 %v2566_v6 }
 0xa00   :  { %v839_v36 = vpop.f32.mrf.mxu0 }
 0xa01   :  { %v867_v41 = vrot.slane %v839_v36, 5  ;;  %v868_v5 = vrot.slane %v839_v36, 6 }
 0xa02   :  { %v841_v45 = vpop.f32.mrf.mxu0 }
 0xa03   :  { %v871_v43 = vadd.f32 %v867_v41, %v2517_v29  ;;  %v872_v44 = vadd.f32 %v868_v5, %v2515_v27  ;;  %v844_v46 = vadd.f32 %v2658_v40, %v841_v45 }
 0xa05   :  { %v875_v58 = vmul.f32 %v2779_v38, %v871_v43  ;;  %v876_v47 = vmul.f32 %v872_v44, %v2719_v61  ;;  %v845_v48 = vmul.f32 %v844_v46, %v2510_v23 }
 0xa07   :  { %2295 = vtanh.f32 %v875_v58 }
 0xa08   :  { %2297 = vtanh.f32 %v876_v47 }
 0xa09   :  { %2299 = vtanh.f32 %v845_v48 }
 0xa14   :  { %v2296_v49 = vpop.eup %2295 }
 0xa15   :  { %v2298_v50 = vpop.eup %2297  ;;  %v879_v56 = vmul.f32 %v2296_v49, %v2779_v38 }
 0xa16   :  { %v2300_v51 = vpop.eup %2299  ;;  %v880_v52 = vmul.f32 %v2298_v50, %v2719_v61 }
 0xa17   :  { %v847_v53 = vmul.f32 %v2300_v51, %v2510_v23  ;;  %v883_v42 = vadd.f32 %v881_v31, %v879_v56 }
 0xa18   :  { %v884_v57 = vadd.f32 %v880_v52, %v711_v2 }
 0xa19   :  { %v848_v39 = vadd.f32 %v847_v53, %v2526_v33  ;;  %v891_v35 = vmul.f32 %v887_v19, %v883_v42 }
 0xa1a   :  { %897 = vrot.lane.b32.xlu1 %v884_v57, %s2464_s0  ;;  %v892_v3 = vmul.f32 %v888_v1, %v884_v57 }
 0xa1b   :  { %851 = vrot.lane.b32.xlu0 %v848_v39, %s2464_s0  ;;  %v849_v4 = vmul.f32 %v848_v39, %v2747_v55 }
 0xa1e   :  { %895 = vrot.lane.b32.xlu1 %v883_v42, %s2464_s0 }
 0xa8c   :  { %v898_v61 = vpop.permute.xlu1 %897 }
 0xa8d   :  { %v902_v60 = vmul.f32 %v898_v61, %v884_v57  ;;  %v852_v62 = vpop.permute.xlu0 %851 }
 0xa8e   :  { %v854_v63 = vmul.f32 %v852_v62, %v848_v39 }
 0xa8f   :  { %907 = vrot.lane.b32.xlu0 %v902_v60, %s2465_s2 }
 0xa90   :  { %856 = vrot.lane.b32.xlu1 %v854_v63, %s2465_s2  ;;  %v896_v2 = vpop.permute.xlu1 %895 }
 0xa91   :  { %v901_v0 = vmul.f32 %v896_v2, %v883_v42 }
 0xa93   :  { %905 = vrot.lane.b32.xlu0 %v901_v0, %s2465_s2 }
 0xb01   :  { %v908_v13 = vpop.permute.xlu0 %907 }
 0xb02   :  { %v857_v28 = vpop.permute.xlu1 %856  ;;  %v2805_v30 = vadd.f32 %v908_v13, %v892_v3 }
 0xb03   :  { %v2807_v32 = vadd.f32 %v857_v28, %v849_v4 }
 0xb04   :  { %2301 = vtanh.f32 %v2805_v30 }
 0xb05   :  { %2303 = vtanh.f32 %v2807_v32  ;;  %v906_v36 = vpop.permute.xlu0 %905 }
 0xb06   :  { %v2811_v41 = vadd.f32 %v906_v36, %v891_v35  ;;  %v1051_v36 = vrot.slane %v2526_v33, 4 }
 0xb08   :  { %2305 = vtanh.f32 %v2811_v41 }
 0xb11   :  { %v2302_v54 = vpop.eup %2301 }
 0xb12   :  { %v2304_v55 = vpop.eup %2303  ;;  %919 = vrot.lane.b32.xlu1 %v2302_v54, %s2464_s0 }
 0xb13   :  { %862 = vrot.lane.b32.xlu0 %v2304_v55, %s2464_s0 }
 0xb15   :  { %v2306_v59 = vpop.eup %2305 }
 0xb16   :  { %917 = vrot.lane.b32.xlu1 %v2306_v59, %s2464_s0 }
 0xb84   :  { %v920_v5 = vpop.permute.xlu1 %919 }
 0xb85   :  { %v924_v45 = vmul.f32 %v920_v5, %v884_v57  ;;  %v863_v43 = vpop.permute.xlu0 %862 }
 0xb86   :  { %v865_v44 = vmul.f32 %v863_v43, %v848_v39 }
 0xb87   :  { %v927_v47 = vrot.slane %v924_v45, 7 }
 0xb88   :  { %v934_v46 = vrot.slane %v865_v44, 5  ;;  %v918_v58 = vpop.permute.xlu1 %917  ;;  %v1058_v44 = vrot.slane %v2805_v30, 7 }
 0xb89   :  { %v923_v48 = vmul.f32 %v918_v58, %v883_v42  ;;  %v2839_v42 = vrot.slane %v2510_v23, 4 }
 0xb8a   :  { %935 = vrot.lane.b32.xlu1 %v934_v46, %s2464_s0 }
 0xb8b   :  { %v929_v49 = vsel %vm928_vm8, %v927_v47, %v923_v48  ;;  %v1057_v48 = vrot.slane %v2811_v41, 7 }
 0xb8c   :  { %930 = vrot.lane.b32.xlu0 %v929_v49, %s2465_s2 }
 0xbfc   :  { %v936_v50 = vpop.permute.xlu1 %935 }
 0xbfe   :  { %v931_v51 = vpop.permute.xlu0 %930 }
 0xbff   :  { %v938_v52 = vsel %vm172_vm0, %v931_v51, %v936_v50 }
 0xc00   :  { %v940_v53 = vrot.slane %v938_v52, 3 }
 0xc02   :  { %2045 = vmatmul.mubr.msk.f32.vlgmr.msra.gmra.mxu1 %vm86_vm2, %v940_v53 }
 0xc03   :  { %1300 = vmatpush1.msra.mxu1 %v2568_v7  ;;  %1347 = vmatprep.mubr.f32.mxu1 %v2462_v17 }
 0xc04   :  { %1301 = vmatprep.subr.mxu1 %v2570_v8 }
 0xc05   :  { %1302 = vmatpush1.msra.mxu1 %v2573_v9 }
 0xc06   :  { %1303 = vmatprep.subr.mxu1 %v2577_v10 }
 0xc07   :  { %1304 = vmatpush1.msra.mxu1 %v2581_v11 }
 0xc08   :  { %1305 = vmatprep.subr.mxu1 %v2585_v12 }
 0xc09   :  { %1306 = vmatpush1.msra.mxu1 %v2589_v14 }
 0xc0a   :  { %1307 = vmatprep.subr.mxu1 %v2594_v15 }
 0xc0b   :  { %1308 = vmatpush1.msra.mxu1 %v2597_v16 }
 0xc0c   :  { %1309 = vmatprep.subr.mxu1 %v2601_v18 }
 0xc0d   :  { %1310 = vmatpush1.msra.mxu1 %v2605_v20 }
 0xc0e   :  { %1311 = vmatprep.subr.mxu1 %v2610_v21 }
 0xc0f   :  { %1312 = vmatpush1.msra.mxu1 %v2613_v22 }
 0xc10   :  { %1313 = vmatprep.subr.mxu1 %v2617_v24 }
 0xc11   :  { %1314 = vmatpush1.msra.mxu1 %v2628_v26 }
 0xc12   :  { %1641 = vmatprep.subr.mxu1 %v2566_v6 }
 0xcc2   :  { %v1009_v57 = vpop.f32.mrf.mxu1 }
 0xcc3   :  { %v1037_v56 = vrot.slane %v1009_v57, 4  ;;  %v1038_v39 = vrot.slane %v1009_v57, 5 }
 0xcc4   :  { %v1011_v61 = vpop.f32.mrf.mxu1 }
 0xcc5   :  { %v1041_v60 = vadd.f32 %v1037_v56, %v2517_v29  ;;  %v1042_v62 = vadd.f32 %v1038_v39, %v2515_v27  ;;  %v1014_v63 = vadd.f32 %v2658_v40, %v1011_v61 }
 0xcc7   :  { %v1045_v2 = vmul.f32 %v2839_v42, %v1041_v60  ;;  %v1046_v0 = vmul.f32 %v1042_v62, %v2779_v38  ;;  %v1015_v1 = vmul.f32 %v1014_v63, %v2510_v23 }
 0xcc9   :  { %2307 = vtanh.f32 %v1045_v2 }
 0xcca   :  { %2309 = vtanh.f32 %v1046_v0 }
 0xccb   :  { %2311 = vtanh.f32 %v1015_v1 }
 0xcd6   :  { %v2308_v6 = vpop.eup %2307 }
 0xcd7   :  { %v2310_v3 = vpop.eup %2309  ;;  %v1049_v35 = vmul.f32 %v2308_v6, %v2839_v42 }
 0xcd8   :  { %v2312_v4 = vpop.eup %2311  ;;  %v1050_v13 = vmul.f32 %v2310_v3, %v2779_v38 }
 0xcd9   :  { %v1017_v19 = vmul.f32 %v2312_v4, %v2510_v23  ;;  %v1053_v55 = vadd.f32 %v1051_v36, %v1049_v35 }
 0xcda   :  { %v1054_v28 = vadd.f32 %v1050_v13, %v881_v31 }
 0xcdb   :  { %v1018_v54 = vadd.f32 %v1017_v19, %v2526_v33  ;;  %v1061_v52 = vmul.f32 %v1057_v48, %v1053_v55 }
 0xcdc   :  { %1067 = vrot.lane.b32.xlu0 %v1054_v28, %s2464_s0  ;;  %v1062_v46 = vmul.f32 %v1058_v44, %v1054_v28 }
 0xcdd   :  { %1021 = vrot.lane.b32.xlu1 %v1018_v54, %s2464_s0  ;;  %v1019_v58 = vmul.f32 %v1018_v54, %v2807_v32 }
 0xce0   :  { %1065 = vrot.lane.b32.xlu0 %v1053_v55, %s2464_s0 }
 0xd4e   :  { %v1068_v38 = vpop.permute.xlu0 %1067 }
 0xd4f   :  { %v1072_v59 = vmul.f32 %v1068_v38, %v1054_v28  ;;  %v1022_v5 = vpop.permute.xlu1 %1021 }
 0xd50   :  { %v1024_v45 = vmul.f32 %v1022_v5, %v1018_v54 }
 0xd51   :  { %1077 = vrot.lane.b32.xlu1 %v1072_v59, %s2465_s2 }
 0xd52   :  { %1026 = vrot.lane.b32.xlu0 %v1024_v45, %s2465_s2  ;;  %v1066_v31 = vpop.permute.xlu0 %1065 }
 0xd53   :  { %v1071_v43 = vmul.f32 %v1066_v31, %v1053_v55 }
 0xd55   :  { %1075 = vrot.lane.b32.xlu1 %v1071_v43, %s2465_s2 }
 0xdc3   :  { %v1078_v47 = vpop.permute.xlu1 %1077 }
 0xdc4   :  { %v1027_v49 = vpop.permute.xlu0 %1026  ;;  %v2865_v50 = vadd.f32 %v1078_v47, %v1062_v46 }
 0xdc5   :  { %v2867_v51 = vadd.f32 %v1027_v49, %v1019_v58  ;;  %v1221_v58 = vrot.slane %v2526_v33, 3 }
 0xdc6   :  { %2313 = vtanh.f32 %v2865_v50 }
 0xdc7   :  { %2315 = vtanh.f32 %v2867_v51  ;;  %v1076_v53 = vpop.permute.xlu1 %1075 }
 0xdc8   :  { %v2871_v57 = vadd.f32 %v1076_v53, %v1061_v52 }
 0xdca   :  { %2317 = vtanh.f32 %v2871_v57 }
 0xdd3   :  { %v2314_v30 = vpop.eup %2313 }
 0xdd4   :  { %v2316_v32 = vpop.eup %2315  ;;  %1089 = vrot.lane.b32.xlu0 %v2314_v30, %s2464_s0 }
 0xdd5   :  { %1032 = vrot.lane.b32.xlu1 %v2316_v32, %s2464_s0  ;;  %v1228_v32 = vrot.slane %v2865_v50, 7 }
 0xdd7   :  { %v2318_v41 = vpop.eup %2317 }
 0xdd8   :  { %1087 = vrot.lane.b32.xlu0 %v2318_v41, %s2464_s0 }
 0xe46   :  { %v1090_v56 = vpop.permute.xlu0 %1089 }
 0xe47   :  { %v1094_v39 = vmul.f32 %v1090_v56, %v1054_v28  ;;  %v1033_v61 = vpop.permute.xlu1 %1032 }
 0xe48   :  { %v1035_v60 = vmul.f32 %v1033_v61, %v1018_v54  ;;  %v1227_v61 = vrot.slane %v2871_v57, 7 }
 0xe49   :  { %v1097_v2 = vrot.slane %v1094_v39, 7 }
 0xe4a   :  { %v1104_v62 = vrot.slane %v1035_v60, 4  ;;  %v1088_v63 = vpop.permute.xlu0 %1087 }
 0xe4b   :  { %v1093_v0 = vmul.f32 %v1088_v63, %v1053_v55 }
 0xe4c   :  { %1105 = vrot.lane.b32.xlu0 %v1104_v62, %s2464_s0 }
 0xe4d   :  { %v1099_v1 = vsel %vm1098_vm9, %v1097_v2, %v1093_v0 }
 0xe4e   :  { %1100 = vrot.lane.b32.xlu1 %v1099_v1, %s2465_s2 }
 0xebe   :  { %v1106_v6 = vpop.permute.xlu0 %1105 }
 0xec0   :  { %v1101_v3 = vpop.permute.xlu1 %1100 }
 0xec1   :  { %v1108_v4 = vsel %vm172_vm0, %v1101_v3, %v1106_v6 }
 0xec2   :  { %v1110_v13 = vrot.slane %v1108_v4, 4 }
 0xec4   :  { %2046 = vmatmul.mubr.msk.f32.vlgmr.msra.gmra.mxu0 %vm86_vm2, %v1110_v13 }
 0xec5   :  { %1470 = vmatpush1.msra.mxu0 %v2568_v7  ;;  %1517 = vmatprep.mubr.f32.mxu0 %v2462_v17 }
 0xec6   :  { %1471 = vmatprep.subr.mxu0 %v2570_v8 }
 0xec7   :  { %1472 = vmatpush1.msra.mxu0 %v2573_v9 }
 0xec8   :  { %1473 = vmatprep.subr.mxu0 %v2577_v10  ;;  %v2899_v10 = vrot.slane %v2510_v23, 3 }
 0xec9   :  { %1474 = vmatpush1.msra.mxu0 %v2581_v11 }
 0xeca   :  { %1475 = vmatprep.subr.mxu0 %v2585_v12 }
 0xecb   :  { %1476 = vmatpush1.msra.mxu0 %v2589_v14 }
 0xecc   :  { %1477 = vmatprep.subr.mxu0 %v2594_v15 }
 0xecd   :  { %1478 = vmatpush1.msra.mxu0 %v2597_v16 }
 0xece   :  { %1479 = vmatprep.subr.mxu0 %v2601_v18 }
 0xecf   :  { %1480 = vmatpush1.msra.mxu0 %v2605_v20 }
 0xed0   :  { %1481 = vmatprep.subr.mxu0 %v2610_v21 }
 0xed1   :  { %1482 = vmatpush1.msra.mxu0 %v2613_v22 }
 0xed2   :  { %1483 = vmatprep.subr.mxu0 %v2617_v24 }
 0xed3   :  { %1484 = vmatpush1.msra.mxu0 %v2628_v26 }
 0xed4   :  { %2155 = vmatprep.subr.mxu0 %v2462_v17 }
 0xf84   :  { %v1179_v7 = vpop.f32.mrf.mxu0 }
 0xf85   :  { %v1207_v8 = vrot.slane %v1179_v7, 3  ;;  %v1208_v9 = vrot.slane %v1179_v7, 4 }
 0xf86   :  { %v1181_v11 = vpop.f32.mrf.mxu0 }
 0xf87   :  { %v1211_v19 = vadd.f32 %v1207_v8, %v2517_v29  ;;  %v1212_v28 = vadd.f32 %v1208_v9, %v2515_v27  ;;  %v1184_v35 = vadd.f32 %v2658_v40, %v1181_v11 }
 0xf89   :  { %v1215_v54 = vmul.f32 %v2899_v10, %v1211_v19  ;;  %v1216_v55 = vmul.f32 %v1212_v28, %v2839_v42  ;;  %v1185_v38 = vmul.f32 %v1184_v35, %v2510_v23 }
 0xf8b   :  { %2319 = vtanh.f32 %v1215_v54 }
 0xf8c   :  { %2321 = vtanh.f32 %v1216_v55 }
 0xf8d   :  { %2323 = vtanh.f32 %v1185_v38  ;;  %v2365_v38 = vld [vmem:[#allocation7 + $0xd0] sm:$0xff] }
 0xf98   :  { %v2320_v59 = vpop.eup %2319 }
 0xf99   :  { %v2322_v5 = vpop.eup %2321  ;;  %v1219_v46 = vmul.f32 %v2320_v59, %v2899_v10  ;;  %v2366_v59 = vld [vmem:[#allocation7 + $0x108] sm:$0xff] }
 0xf9a   :  { %v2324_v45 = vpop.eup %2323  ;;  %v1220_v31 = vmul.f32 %v2322_v5, %v2839_v42  ;;  %v2367_v5 = vld [vmem:[#allocation7 + $0xc8] sm:$0xff] }
 0xf9b   :  { %v1187_v43 = vmul.f32 %v2324_v45, %v2510_v23  ;;  %v1223_v48 = vadd.f32 %v1221_v58, %v1219_v46  ;;  %v2368_v45 = vld [vmem:[#allocation7 + $0x100] sm:$0xff] }
 0xf9c   :  { %v1224_v44 = vadd.f32 %v1220_v31, %v1051_v36  ;;  %v2369_v31 = vld [vmem:[#allocation7 + $0xc0] sm:$0xff] }
 0xf9d   :  { %v1188_v47 = vadd.f32 %v1187_v43, %v2526_v33  ;;  %v1231_v2 = vmul.f32 %v1227_v61, %v1223_v48 }
 0xf9e   :  { %1237 = vrot.lane.b32.xlu1 %v1224_v44, %s2464_s0  ;;  %v1232_v41 = vmul.f32 %v1228_v32, %v1224_v44 }
 0xf9f   :  { %1191 = vrot.lane.b32.xlu0 %v1188_v47, %s2464_s0  ;;  %v1189_v56 = vmul.f32 %v1188_v47, %v2867_v51 }
 0xfa2   :  { %1235 = vrot.lane.b32.xlu1 %v1223_v48, %s2464_s0 }
0x1010   :  { %v1238_v42 = vpop.permute.xlu1 %1237 }
0x1011   :  { %v1242_v49 = vmul.f32 %v1238_v42, %v1224_v44  ;;  %v1192_v52 = vpop.permute.xlu0 %1191 }
0x1012   :  { %v1194_v53 = vmul.f32 %v1192_v52, %v1188_v47  ;;  %v1391_v52 = vrot.slane %v2526_v33, 2 }
0x1013   :  { %1247 = vrot.lane.b32.xlu0 %v1242_v49, %s2465_s2 }
0x1014   :  { %1196 = vrot.lane.b32.xlu1 %v1194_v53, %s2465_s2  ;;  %v1236_v36 = vpop.permute.xlu1 %1235 }
0x1015   :  { %v1241_v30 = vmul.f32 %v1236_v36, %v1223_v48 }
0x1017   :  { %1245 = vrot.lane.b32.xlu0 %v1241_v30, %s2465_s2 }
0x1085   :  { %v1248_v39 = vpop.permute.xlu0 %1247 }
0x1086   :  { %v1197_v60 = vpop.permute.xlu1 %1196  ;;  %v2925_v62 = vadd.f32 %v1248_v39, %v1232_v41 }
0x1087   :  { %v2927_v63 = vadd.f32 %v1197_v60, %v1189_v56 }
0x1088   :  { %2325 = vtanh.f32 %v2925_v62  ;;  %v1398_v39 = vrot.slane %v2925_v62, 7 }
0x1089   :  { %2327 = vtanh.f32 %v2927_v63  ;;  %v1246_v0 = vpop.permute.xlu0 %1245 }
0x108a   :  { %v2931_v1 = vadd.f32 %v1246_v0, %v1231_v2 }
0x108c   :  { %2329 = vtanh.f32 %v2931_v1  ;;  %v1397_v0 = vrot.slane %v2931_v1, 7 }
0x1095   :  { %v2326_v50 = vpop.eup %2325 }
0x1096   :  { %v2328_v51 = vpop.eup %2327  ;;  %1259 = vrot.lane.b32.xlu1 %v2326_v50, %s2464_s0 }
0x1097   :  { %1202 = vrot.lane.b32.xlu0 %v2328_v51, %s2464_s0 }
0x1099   :  { %v2330_v57 = vpop.eup %2329 }
0x109a   :  { %1257 = vrot.lane.b32.xlu1 %v2330_v57, %s2464_s0 }
0x1108   :  { %v1260_v6 = vpop.permute.xlu1 %1259 }
0x1109   :  { %v1264_v3 = vmul.f32 %v1260_v6, %v1224_v44  ;;  %v1203_v4 = vpop.permute.xlu0 %1202 }
0x110a   :  { %v1205_v13 = vmul.f32 %v1203_v4, %v1188_v47 }
0x110b   :  { %v1267_v9 = vrot.slane %v1264_v3, 7 }
0x110c   :  { %v1274_v7 = vrot.slane %v1205_v13, 3  ;;  %v1258_v8 = vpop.permute.xlu1 %1257 }
0x110d   :  { %v1263_v11 = vmul.f32 %v1258_v8, %v1223_v48 }
0x110e   :  { %1275 = vrot.lane.b32.xlu1 %v1274_v7, %s2464_s0 }
0x110f   :  { %v1269_v19 = vsel %vm1268_vm10, %v1267_v9, %v1263_v11 }
0x1110   :  { %1270 = vrot.lane.b32.xlu0 %v1269_v19, %s2465_s2 }
0x1180   :  { %v1276_v28 = vpop.permute.xlu1 %1275 }
0x1182   :  { %v1271_v35 = vpop.permute.xlu0 %1270 }
0x1183   :  { %v1278_v54 = vsel %vm172_vm0, %v1271_v35, %v1276_v28 }
0x1184   :  { %v1280_v55 = vrot.slane %v1278_v54, 5 }
0x1186   :  { %2047 = vmatmul.mubr.msk.f32.vlgmr.msra.gmra.mxu1 %vm86_vm2, %v1280_v55 }
0x1187   :  { %1642 = vmatpush1.msra.mxu1 %v2365_v38  ;;  %1689 = vmatprep.mubr.f32.mxu1 %v2462_v17 }
0x1188   :  { %1643 = vmatprep.subr.mxu1 %v2366_v59 }
0x1189   :  { %1644 = vmatpush1.msra.mxu1 %v2367_v5 }
0x118a   :  { %1645 = vmatprep.subr.mxu1 %v2368_v45 }
0x118b   :  { %1646 = vmatpush1.msra.mxu1 %v2369_v31 }
0x118c   :  { %1647 = vmatprep.subr.mxu1 %v2585_v12 }
0x118d   :  { %1648 = vmatpush1.msra.mxu1 %v2589_v14 }
0x118e   :  { %1649 = vmatprep.subr.mxu1 %v2594_v15  ;;  %v2954_v15 = vrot.slane %v2510_v23, 2 }
0x118f   :  { %1650 = vmatpush1.msra.mxu1 %v2597_v16 }
0x1190   :  { %1651 = vmatprep.subr.mxu1 %v2601_v18 }
0x1191   :  { %1652 = vmatpush1.msra.mxu1 %v2605_v20 }
0x1192   :  { %1653 = vmatprep.subr.mxu1 %v2610_v21 }
0x1193   :  { %1654 = vmatpush1.msra.mxu1 %v2613_v22 }
0x1194   :  { %1655 = vmatprep.subr.mxu1 %v2617_v24 }
0x1195   :  { %1656 = vmatpush1.msra.mxu1 %v2628_v26 }
0x1196   :  { %2190 = vmatprep.subr.mxu1 %v2462_v17 }
0x1246   :  { %v1349_v12 = vpop.f32.mrf.mxu1 }
0x1247   :  { %v1377_v14 = vrot.slane %v1349_v12, 2  ;;  %v1378_v43 = vrot.slane %v1349_v12, 3 }
0x1248   :  { %v1351_v16 = vpop.f32.mrf.mxu1 }
0x1249   :  { %v1381_v18 = vadd.f32 %v1377_v14, %v2517_v29  ;;  %v1382_v20 = vadd.f32 %v1378_v43, %v2515_v27  ;;  %v1354_v21 = vadd.f32 %v2658_v40, %v1351_v16 }
0x124b   :  { %v1385_v22 = vmul.f32 %v2954_v15, %v1381_v18  ;;  %v1386_v24 = vmul.f32 %v1382_v20, %v2899_v10  ;;  %v1355_v26 = vmul.f32 %v1354_v21, %v2510_v23  ;;  %v3000_v18 = vld [vmem:[#allocation7 + $0x118] ss:$0 sm:$0xff] }
0x124d   :  { %2331 = vtanh.f32 %v1385_v22 }
0x124e   :  { %2333 = vtanh.f32 %v1386_v24 }
0x124f   :  { %2335 = vtanh.f32 %v1355_v26 }
0x125a   :  { %v2332_v44 = vpop.eup %2331 }
0x125b   :  { %v2334_v46 = vpop.eup %2333  ;;  %v1389_v40 = vmul.f32 %v2332_v44, %v2954_v15 }
0x125c   :  { %v2336_v47 = vpop.eup %2335  ;;  %v1390_v48 = vmul.f32 %v2334_v46, %v2899_v10 }
0x125d   :  { %v1357_v42 = vmul.f32 %v2336_v47, %v2510_v23  ;;  %v1393_v36 = vadd.f32 %v1391_v52, %v1389_v40 }
0x125e   :  { %v1394_v49 = vadd.f32 %v1390_v48, %v1221_v58 }
0x125f   :  { %v1358_v53 = vadd.f32 %v1357_v42, %v2526_v33  ;;  %v1401_v6 = vmul.f32 %v1397_v0, %v1393_v36 }
0x1260   :  { %1407 = vrot.lane.b32.xlu0 %v1394_v49, %s2464_s0  ;;  %v1402_v61 = vmul.f32 %v1398_v39, %v1394_v49 }
0x1261   :  { %1361 = vrot.lane.b32.xlu1 %v1358_v53, %s2464_s0  ;;  %v1359_v60 = vmul.f32 %v1358_v53, %v2927_v63 }
0x1264   :  { %1405 = vrot.lane.b32.xlu0 %v1393_v36, %s2464_s0 }
0x12d2   :  { %v1408_v10 = vpop.permute.xlu0 %1407 }
0x12d3   :  { %v1412_v30 = vmul.f32 %v1408_v10, %v1394_v49  ;;  %v1362_v32 = vpop.permute.xlu1 %1361 }
0x12d4   :  { %v1364_v41 = vmul.f32 %v1362_v32, %v1358_v53 }
0x12d5   :  { %1417 = vrot.lane.b32.xlu1 %v1412_v30, %s2465_s2 }
0x12d6   :  { %1366 = vrot.lane.b32.xlu0 %v1364_v41, %s2465_s2  ;;  %v1406_v58 = vpop.permute.xlu0 %1405 }
0x12d7   :  { %v1411_v56 = vmul.f32 %v1406_v58, %v1393_v36 }
0x12d9   :  { %1415 = vrot.lane.b32.xlu1 %v1411_v56, %s2465_s2 }
0x1347   :  { %v1418_v2 = vpop.permute.xlu1 %1417 }
0x1348   :  { %v1367_v50 = vpop.permute.xlu0 %1366  ;;  %v2980_v51 = vadd.f32 %v1418_v2, %v1402_v61 }
0x1349   :  { %v2982_v57 = vadd.f32 %v1367_v50, %v1359_v60 }
0x134a   :  { %2337 = vtanh.f32 %v2980_v51 }
0x134b   :  { %2339 = vtanh.f32 %v2982_v57  ;;  %v1416_v3 = vpop.permute.xlu1 %1415 }
0x134c   :  { %v2986_v4 = vadd.f32 %v1416_v3, %v1401_v6 }
0x134e   :  { %2341 = vtanh.f32 %v2986_v4  ;;  %v1563_v56 = vrot.slane %v2986_v4, 7 }
0x1357   :  { %v2338_v62 = vpop.eup %2337 }
0x1358   :  { %v2340_v63 = vpop.eup %2339  ;;  %1429 = vrot.lane.b32.xlu0 %v2338_v62, %s2464_s0 }
0x1359   :  { %1372 = vrot.lane.b32.xlu1 %v2340_v63, %s2464_s0 }
0x135b   :  { %v2342_v1 = vpop.eup %2341 }
0x135c   :  { %1427 = vrot.lane.b32.xlu0 %v2342_v1, %s2464_s0 }
0x13ca   :  { %v1430_v13 = vpop.permute.xlu0 %1429 }
0x13cb   :  { %v1434_v7 = vmul.f32 %v1430_v13, %v1394_v49  ;;  %v1373_v8 = vpop.permute.xlu1 %1372 }
0x13cc   :  { %v1375_v9 = vmul.f32 %v1373_v8, %v1358_v53 }
0x13cd   :  { %v1437_v28 = vrot.slane %v1434_v7, 7 }
0x13ce   :  { %v1444_v11 = vrot.slane %v1375_v9, 2  ;;  %v1428_v19 = vpop.permute.xlu0 %1427 }
0x13cf   :  { %v1433_v35 = vmul.f32 %v1428_v19, %v1393_v36 }
0x13d0   :  { %1445 = vrot.lane.b32.xlu0 %v1444_v11, %s2464_s0 }
0x13d1   :  { %v1439_v54 = vsel %vm1438_vm11, %v1437_v28, %v1433_v35 }
0x13d2   :  { %1440 = vrot.lane.b32.xlu1 %v1439_v54, %s2465_s2 }
0x1442   :  { %v1446_v55 = vpop.permute.xlu0 %1445 }
0x1444   :  { %v1441_v38 = vpop.permute.xlu1 %1440 }
0x1445   :  { %v1448_v59 = vsel %vm172_vm0, %v1441_v38, %v1446_v55 }
0x1446   :  { %v1450_v5 = vrot.slane %v1448_v59, 6 }
0x1448   :  { %2048 = vmatmul.mubr.msk.f32.vlgmr.msra.gmra.mxu0 %vm86_vm2, %v1450_v5 }
0x1449   :  { %2187 = vmatprep.mubr.msk.f32.mxu0 %vm2466_vm4, %v2462_v17 }
0x1508   :  { %v1519_v45 = vpop.f32.mrf.mxu0 }
0x1509   :  { %v1547_v31 = vrot.slane %v1519_v45, 1  ;;  %v1548_v12 = vrot.slane %v1519_v45, 2 }
0x150a   :  { %v1521_v14 = vpop.f32.mrf.mxu0 }
0x150b   :  { %v1551_v43 = vadd.f32 %v1547_v31, %v2517_v29  ;;  %v1552_v16 = vadd.f32 %v1548_v12, %v2515_v27  ;;  %v1524_v20 = vadd.f32 %v3000_v18, %v1521_v14 }
0x150d   :  { %v1553_v21 = vmul.f32 %v1551_v43, %v2513_v25  ;;  %v1554_v22 = vmul.f32 %v1552_v16, %v2954_v15  ;;  %v1525_v24 = vmul.f32 %v1524_v20, %v2510_v23 }
0x150f   :  { %2343 = vtanh.f32 %v1553_v21 }
0x1510   :  { %2345 = vtanh.f32 %v1554_v22 }
0x1511   :  { %2347 = vtanh.f32 %v1525_v24  ;;  %v1757_v24 = vld [vmem:[#allocation7 + $0x198] sm:$0xff] }
0x1512   :  { %2156 = vmatpush3.msra.mxu0 %v1757_v24  ;;  %v1934_v24 = vld [vmem:[#allocation7 + $0x238] sm:$0xff] }
0x1513   :  { %2157 = vmatprep.subr.mxu0 %v2462_v17 }
0x151c   :  { %v2344_v26 = vpop.eup %2343 }
0x151d   :  { %v2346_v44 = vpop.eup %2345  ;;  %v1557_v42 = vmul.f32 %v2344_v26, %v2513_v25  ;;  %v1564_v25 = vrot.slane %v2980_v51, 7 }
0x151e   :  { %v2348_v46 = vpop.eup %2347  ;;  %v1558_v29 = vmul.f32 %v2346_v44, %v2954_v15  ;;  %v1754_v44 = vld [vmem:[#allocation7 + $0x180] sm:$0xff] }
0x151f   :  { %v1527_v27 = vmul.f32 %v2348_v46, %v2510_v23  ;;  %v1559_v49 = vadd.f32 %v1557_v42, %v379_v34  ;;  %v1753_v46 = vld [vmem:[#allocation7 + $0x178] sm:$0xff]  ;;  %v1748_v42 = vld [vmem:[#allocation7 + $0x150] sm:$0xff] }
0x1520   :  { %v1560_v47 = vadd.f32 %v1558_v29, %v1391_v52  ;;  %v1752_v29 = vld [vmem:[#allocation7 + $0x170] sm:$0xff] }
0x1521   :  { %v1528_v48 = vadd.f32 %v1527_v27, %v2526_v33  ;;  %v1567_v61 = vmul.f32 %v1563_v56, %v1559_v49  ;;  %v1751_v27 = vld [vmem:[#allocation7 + $0x168] sm:$0xff]  ;;  %v1852_v56 = vld [vmem:[#allocation7 + $0x200] sm:$0xff] }
0x1522   :  { %1573 = vrot.lane.b32.xlu0 %v1560_v47, %s2464_s0  ;;  %v1568_v30 = vmul.f32 %v1564_v25, %v1560_v47  ;;  %v1856_v25 = vld [vmem:[#allocation7 + $0x220] sm:$0xff] }
0x1523   :  { %1531 = vrot.lane.b32.xlu1 %v1528_v48, %s2464_s0  ;;  %v1529_v32 = vmul.f32 %v1528_v48, %v2982_v57 }
0x1527   :  { %1571 = vrot.lane.b32.xlu1 %v1559_v49, %s2464_s0 }
0x1594   :  { %v1574_v40 = vpop.permute.xlu0 %1573 }
0x1595   :  { %v1578_v15 = vmul.f32 %v1574_v40, %v1560_v47  ;;  %v1532_v53 = vpop.permute.xlu1 %1531  ;;  %v1746_v40 = vld [vmem:[#allocation7 + $0x140] sm:$0xff] }
0x1596   :  { %v1534_v36 = vmul.f32 %v1532_v53, %v1528_v48  ;;  %v1744_v53 = vld [vmem:[#allocation7 + $0x130] sm:$0xff] }
0x1597   :  { %1583 = vrot.lane.b32.xlu1 %v1578_v15, %s2465_s2  ;;  %v1745_v15 = vld [vmem:[#allocation7 + $0x138] sm:$0xff] }
0x1598   :  { %1536 = vrot.lane.b32.xlu0 %v1534_v36, %s2465_s2  ;;  %v1743_v36 = vld [vmem:[#allocation7 + $0x128] sm:$0xff] }
0x1599   :  { %v1572_v52 = vpop.permute.xlu1 %1571 }
0x159a   :  { %v1577_v10 = vmul.f32 %v1572_v52, %v1559_v49  ;;  %v1742_v52 = vld [vmem:[#allocation7 + $0x120] sm:$0xff] }
0x159c   :  { %1581 = vrot.lane.b32.xlu0 %v1577_v10, %s2465_s2 }
0x1609   :  { %v1584_v34 = vpop.permute.xlu1 %1583 }
0x160a   :  { %v1537_v41 = vpop.permute.xlu0 %1536  ;;  %v1588_v58 = vadd.f32 %v1584_v34, %v1568_v30  ;;  %v1855_v30 = vld [vmem:[#allocation7 + $0x218] sm:$0xff]  ;;  %v1854_v34 = vld [vmem:[#allocation7 + $0x210] sm:$0xff] }
0x160b   :  { %v1539_v39 = vadd.f32 %v1537_v41, %v1529_v32 }
0x160c   :  { %2349 = vtanh.f32 %v1588_v58  ;;  %v1724_v2 = vrot.slane %v1588_v58, 7  ;;  %v1853_v58 = vld [vmem:[#allocation7 + $0x208] sm:$0xff] }
0x160d   :  { %2351 = vtanh.f32 %v1539_v39 }
0x160e   :  { %v1582_v60 = vpop.permute.xlu0 %1581 }
0x160f   :  { %v1587_v0 = vadd.f32 %v1582_v60, %v1567_v61  ;;  %v1851_v61 = vld [vmem:[#allocation7 + $0x1f8] sm:$0xff] }
0x1611   :  { %2353 = vtanh.f32 %v1587_v0  ;;  %v2252_v50 = vpack.i.bf16 %v1724_v2, %v1587_v0 }
0x1619   :  { %v2350_v6 = vpop.eup %2349 }
0x161a   :  { %v2352_v3 = vpop.eup %2351  ;;  %1595 = vrot.lane.b32.xlu0 %v2350_v6, %s2464_s0 }
0x161b   :  { %1542 = vrot.lane.b32.xlu1 %v2352_v3, %s2464_s0 }
0x161e   :  { %v2354_v51 = vpop.eup %2353 }
0x161f   :  { %1593 = vrot.lane.b32.xlu1 %v2354_v51, %s2464_s0 }
0x168c   :  { %v1596_v57 = vpop.permute.xlu0 %1595 }
0x168d   :  { %v1600_v4 = vmul.f32 %v1596_v57, %v1560_v47  ;;  %v1543_v62 = vpop.permute.xlu1 %1542  ;;  %v1750_v47 = vld [vmem:[#allocation7 + $0x160] sm:$0xff] }
0x168e   :  { %v1545_v13 = vmul.f32 %v1543_v62, %v1528_v48  ;;  %v1749_v48 = vld [vmem:[#allocation7 + $0x158] sm:$0xff] }
0x168f   :  { %v1603_v63 = vrot.slane %v1600_v4, 7 }
0x1690   :  { %v1611_v8 = vrot.slane %v1545_v13, 1 }
0x1691   :  { %v1594_v1 = vpop.permute.xlu1 %1593  ;;  %1606 = vrot.lane.b32.xlu1 %v1603_v63, %s2465_s2 }
0x1692   :  { %v1599_v7 = vmul.f32 %v1594_v1, %v1559_v49  ;;  %v1747_v49 = vld [vmem:[#allocation7 + $0x148] sm:$0xff] }
0x1694   :  { %1604 = vrot.lane.b32.xlu0 %v1599_v7, %s2465_s2 }
0x1698   :  { %1612 = vrot.lane.b32.xlu0 %v1611_v8, %s2464_s0  ;;  %v1850_v8 = vld [vmem:[#allocation7 + $0x1f0] sm:$0xff] }
0x1703   :  { %v3031_v11 = vpop.permute.xlu1 %1606 }
0x1706   :  { %v3029_v9 = vpop.permute.xlu0 %1604 }
0x170a   :  { %v1613_v19 = vpop.permute.xlu0 %1612 }
0x170b   :  { %v1615_v28 = vsel %vm172_vm0, %v3029_v9, %v1613_v19  ;;  %v1616_v35 = vsel %vm172_vm0, %v3031_v11, %v1613_v19  ;;  %v1847_v19 = vld [vmem:[#allocation7 + $0x1d8] sm:$0xff] }
0x170c   :  { %v1620_v54 = vrot.slane %v1615_v28, 7  ;;  %v1621_v55 = vrot.slane %v1616_v35, 7  ;;  %v1846_v28 = vld [vmem:[#allocation7 + $0x1d0] sm:$0xff]  ;;  %v1845_v35 = vld [vmem:[#allocation7 + $0x1c8] sm:$0xff] }
0x170e   :  { %v1622_v38 = vsel %vm1619_vm12, %v1620_v54, %v1621_v55  ;;  %v1844_v54 = vld [vmem:[#allocation7 + $0x1c0] sm:$0xff]  ;;  %v1843_v55 = vld [vmem:[#allocation7 + $0x1b8] sm:$0xff] }
0x170f   :  { %2049 = vmatmul.mubr.msk.f32.vlgmr.msra.gmra.mxu1 %vm86_vm2, %v1622_v38  ;;  %v1842_v38 = vld [vmem:[#allocation7 + $0x1b0] sm:$0xff] }
0x1710   :  { %2222 = vmatprep.mubr.msk.f32.mxu1 %vm2466_vm4, %v2462_v17  ;;  %2191 = vmatpush3.msra.mxu1 %v1856_v25 }
0x1711   :  { %2192 = vmatprep.subr.mxu1 %v2462_v17 }
0x1712   :  { %2193 = vmatpush3.msra.mxu1 %v1855_v30 }
0x1713   :  { %2194 = vmatprep.subr.mxu1 %v2462_v17 }
0x1714   :  { %2195 = vmatpush3.msra.mxu1 %v1854_v34 }
0x1715   :  { %2196 = vmatprep.subr.mxu1 %v2462_v17 }
0x1716   :  { %2197 = vmatpush3.msra.mxu1 %v1853_v58 }
0x1717   :  { %2198 = vmatprep.subr.mxu1 %v2462_v17 }
0x1718   :  { %2199 = vmatpush3.msra.mxu1 %v1852_v56 }
0x1719   :  { %2200 = vmatprep.subr.mxu1 %v2462_v17 }
0x171a   :  { %2201 = vmatpush3.msra.mxu1 %v1851_v61 }
0x171b   :  { %2202 = vmatprep.subr.mxu1 %v2462_v17 }
0x171c   :  { %2203 = vmatpush3.msra.mxu1 %v1850_v8 }
0x171d   :  { %2204 = vmatprep.subr.mxu1 %v2462_v17 }
0x17cf   :  { %v1691_v59 = vpop.f32.mrf.mxu1 }
0x17d0   :  { %v1841_v59 = vld [vmem:[#allocation7 + $0x1a8] sm:$0xff] }
0x17d1   :  { %v1692_v5 = vpop.f32.mrf.mxu1 }
0x17d2   :  { %v1695_v45 = vadd.f32 %v3000_v18, %v1692_v5  ;;  %v2033_v5 = vld [vmem:[#allocation7 + $0x40] ss:$0 sm:$0xff] }
0x17d4   :  { %v1696_v31 = vmul.f32 %v1695_v45, %v2510_v23  ;;  %v157_v45 = vadd.f32 %v2033_v5, %v2637_v37  ;;  %v1933_v37 = vld [vmem:[#allocation7 + $0x230] sm:$0xff] }
0x17d6   :  { %2355 = vtanh.f32 %v1696_v31  ;;  %v2050_v31 = vld [vmem:[#allocation7 + $0x1a0] ss:$0 sm:$0xff] }
0x17e3   :  { %v2356_v12 = vpop.eup %2355 }
0x17e4   :  { %v1698_v14 = vmul.f32 %v2356_v12, %v2510_v23  ;;  %v1756_v23 = vld [vmem:[#allocation7 + $0x190] sm:$0xff] }
0x17e5   :  { %2158 = vmatpush3.msra.mxu0 %v1756_v23  ;;  %v2051_v23 = vld [vmem:[#allocation7 + $0x228] ss:$0 sm:$0xff] }
0x17e6   :  { %v3045_v43 = vadd.f32 %v1698_v14, %v2526_v33  ;;  %v1755_v33 = vld [vmem:[#allocation7 + $0x188] sm:$0xff]  ;;  %2159 = vmatprep.subr.mxu0 %v2462_v17 }
0x17e7   :  { %2160 = vmatpush3.msra.mxu0 %v1755_v33 }
0x17e8   :  { %1702 = vrot.lane.b32.xlu1 %v3045_v43, %s2464_s0  ;;  %v1700_v21 = vmul.f32 %v3045_v43, %v1539_v39  ;;  %2161 = vmatprep.subr.mxu0 %v2462_v17 }
0x17e9   :  { %2162 = vmatpush3.msra.mxu0 %v1754_v44 }
0x17ea   :  { %2163 = vmatprep.subr.mxu0 %v2462_v17 }
0x17eb   :  { %2164 = vmatpush3.msra.mxu0 %v1753_v46 }
0x17ec   :  { %2165 = vmatprep.subr.mxu0 %v2462_v17 }
0x17ed   :  { %2166 = vmatpush3.msra.mxu0 %v1752_v29  ;;  %v2052_v29 = vld [vmem:[#allocation7 + $0x250] ss:$0 sm:$0xff] }
0x17ee   :  { %2167 = vmatprep.subr.mxu0 %v2462_v17 }
0x17ef   :  { %2168 = vmatpush3.msra.mxu0 %v1751_v27 }
0x17f0   :  { %2169 = vmatprep.subr.mxu0 %v2462_v17 }
0x17f1   :  { %2170 = vmatpush3.msra.mxu0 %v1750_v47 }
0x17f2   :  { %2171 = vmatprep.subr.mxu0 %v2462_v17 }
0x17f3   :  { %2172 = vmatpush3.msra.mxu0 %v1749_v48 }
0x17f4   :  { %2173 = vmatprep.subr.mxu0 %v2462_v17 }
0x17f5   :  { %2174 = vmatpush3.msra.mxu0 %v1748_v42 }
0x17f6   :  { %2175 = vmatprep.subr.mxu0 %v2462_v17 }
0x17f7   :  { %2176 = vmatpush3.msra.mxu0 %v1747_v49 }
0x17f8   :  { %2177 = vmatprep.subr.mxu0 %v2462_v17 }
0x17f9   :  { %2178 = vmatpush3.msra.mxu0 %v1746_v40 }
0x17fa   :  { %2179 = vmatprep.subr.mxu0 %v2462_v17 }
0x17fb   :  { %2180 = vmatpush3.msra.mxu0 %v1745_v15 }
0x17fc   :  { %2181 = vmatprep.subr.mxu0 %v2462_v17 }
0x17fd   :  { %2182 = vmatpush3.msra.mxu0 %v1744_v53 }
0x17fe   :  { %2183 = vmatprep.subr.mxu0 %v2462_v17 }
0x17ff   :  { %2184 = vmatpush3.msra.mxu0 %v1743_v36 }
0x1800   :  { %2185 = vmatprep.subr.mxu0 %v2462_v17 }
0x1801   :  { %2186 = vmatpush3.msra.mxu0 %v1742_v52 }
0x1802   :  { %2225 = vmatprep.subr.mxu0 %v2462_v17 }
0x185a   :  { %v1703_v16 = vpop.permute.xlu1 %1702 }
0x185b   :  { %v1705_v20 = vmul.f32 %v1703_v16, %v3045_v43 }
0x185d   :  { %1707 = vrot.lane.b32.xlu0 %v1705_v20, %s2465_s2 }
0x18cf   :  { %v1708_v18 = vpop.permute.xlu0 %1707 }
0x18d0   :  { %v3052_v22 = vadd.f32 %v1708_v18, %v1700_v21  ;;  %v1936_v18 = vld [vmem:[#allocation7 + $0x248] sm:$0xff] }
0x18d2   :  { %2357 = vtanh.f32 %v3052_v22  ;;  %v1732_v39 = vrot.slane %v3052_v22, 1  ;;  %v1935_v22 = vld [vmem:[#allocation7 + $0x240] sm:$0xff] }
0x18d3   :  { %2359 = vtanh.f32 %v157_v45 }
0x18df   :  { %v2358_v26 = vpop.eup %2357 }
0x18e0   :  { %1713 = vrot.lane.b32.xlu1 %v2358_v26, %s2464_s0  ;;  %v2360_v16 = vpop.eup %2359 }
0x18e4   :  { %2253 = vrot.lane.b32.xlu1 %v2252_v50, %s2465_s2 }
0x1952   :  { %v1714_v10 = vpop.permute.xlu1 %1713 }
0x1953   :  { %v1716_v32 = vmul.f32 %v1714_v10, %v3045_v43 }
0x1955   :  { %v1718_v41 = vrot.slane %v1716_v32, 1 }
0x1956   :  { %v2254_v60 = vpop.permute.xlu1 %2253 }
0x1957   :  { %1719 = vrot.lane.b32.xlu0 %v1718_v41, %s2464_s0  ;;  %v2256_v6 = vunpack.i.h.bf16 %v2254_v60  ;;  %v2255_v3 = vunpack.i.l.bf16 %v2254_v60 }
0x195b   :  { %1733 = vrot.lane.b32.xlu0 %v1732_v39, %s2464_s0 }
0x19c9   :  { %v1720_v2 = vpop.permute.xlu0 %1719 }
0x19ca   :  { %v1736_v0 = vsel %vm172_vm0, %v3029_v9, %v1720_v2  ;;  %v1737_v50 = vsel %vm172_vm0, %v3031_v11, %v1720_v2  ;;  %v1849_v9 = vld [vmem:[#allocation7 + $0x1e8] sm:$0xff]  ;;  %v1848_v11 = vld [vmem:[#allocation7 + $0x1e0] sm:$0xff] }
0x19cb   :  { %v1738_v57 = vsel %vm86_vm2, %v1736_v0, %v2255_v3  ;;  %v1739_v4 = vsel %vm86_vm2, %v1737_v50, %v2256_v6  ;;  %2205 = vmatpush3.msra.mxu1 %v1849_v9 }
0x19cc   :  { %2206 = vmatprep.subr.mxu1 %v2462_v17 }
0x19cd   :  { %v1734_v51 = vpop.permute.xlu0 %1733  ;;  %2207 = vmatpush3.msra.mxu1 %v1848_v11 }
0x19ce   :  { %v1740_v62 = vsel %vm364_vm3, %v1738_v57, %v1734_v51  ;;  %v1741_v63 = vsel %vm364_vm3, %v1739_v4, %v1734_v51  ;;  %2208 = vmatprep.subr.mxu1 %v2462_v17 }
0x19cf   :  { %v1765_v1 = vrot.slane %v1740_v62, 7  ;;  %v1766_v13 = vrot.slane %v1741_v63, 7  ;;  %2209 = vmatpush3.msra.mxu1 %v1847_v19 }
0x19d0   :  { %2210 = vmatprep.subr.mxu1 %v2462_v17 }
0x19d1   :  { %v1767_v7 = vsel %vm1619_vm12, %v1765_v1, %v1766_v13  ;;  %2211 = vmatpush3.msra.mxu1 %v1846_v28 }
0x19d2   :  { %2188 = vmatmul.mubr.f32.vlgmr.msra.gmra.mxu0 %v1767_v7  ;;  %2212 = vmatprep.subr.mxu1 %v2462_v17 }
0x19d3   :  { %2233 = vmatprep.mubr.msk.f32.mxu0 %vm2466_vm4, %v2462_v17  ;;  %2213 = vmatpush3.msra.mxu1 %v1845_v35 }
0x19d4   :  { %2214 = vmatprep.subr.mxu1 %v2462_v17  ;;  %2226 = vmatpush3.msra.mxu0 %v1936_v18 }
0x19d5   :  { %2215 = vmatpush3.msra.mxu1 %v1844_v54  ;;  %2227 = vmatprep.subr.mxu0 %v2462_v17 }
0x19d6   :  { %2216 = vmatprep.subr.mxu1 %v2462_v17  ;;  %2228 = vmatpush3.msra.mxu0 %v1935_v22 }
0x19d7   :  { %2217 = vmatpush3.msra.mxu1 %v1843_v55  ;;  %2229 = vmatprep.subr.mxu0 %v2462_v17 }
0x19d8   :  { %2218 = vmatprep.subr.mxu1 %v2462_v17  ;;  %2230 = vmatpush3.msra.mxu0 %v1934_v24 }
0x19d9   :  { %2219 = vmatpush3.msra.mxu1 %v1842_v38  ;;  %2231 = vmatprep.subr.mxu0 %v2462_v17 }
0x19da   :  { %2220 = vmatprep.subr.mxu1 %v2462_v17  ;;  %2232 = vmatpush3.msra.mxu0 %v1933_v37 }
0x19db   :  { %2221 = vmatpush3.msra.mxu1 %v1841_v59 }
0x1a92   :  { %v1835_v12 = vpop.f32.mrf.mxu0 }
0x1a93   :  { %v1836_v14 = vadd.f32 %v2050_v31, %v1835_v12 }
0x1a94   :  { %v2189_v43 = vpop.f32.mrf.mxu0 }
0x1a95   :  { %2361 = vtanh.f32 %v1836_v14 }
0x1aa2   :  { %v2362_v20 = vpop.eup %2361 }
0x1aa3   :  { %v1840_v21 = vmul.f32 %v2362_v20, %v2360_v16 }
0x1aa5   :  { %2223 = vmatmul.mubr.f32.vlgmr.msra.gmra.mxu1 %v1840_v21 }
0x1b65   :  { %v1928_v33 = vpop.f32.mrf.mxu1 }
0x1b66   :  { %v1929_v26 = vadd.f32 %v2051_v23, %v1928_v33 }
0x1b67   :  { %v2224_v44 = vpop.f32.mrf.mxu1 }
0x1b68   :  { %2363 = vtanh.f32 %v1929_v26 }
0x1b75   :  { %v2364_v46 = vpop.eup %2363 }
0x1b76   :  { %2234 = vmatmul.mubr.msk.f32.vlgmr.msra.gmra.mxu0 %vm172_vm0, %v2364_v46 }
0x1c36   :  { %v2011_v27 = vpop.f32.mrf.mxu0 }
0x1c37   :  { %v2012_v47 = vadd.f32 %v2052_v29, %v2011_v27 }
0x1c38   :  { %v2235_v48 = vpop.f32.mrf.mxu0 }
0x1c39   :  { %2016 = vst.msk [vmem:[#allocation8] sm:$0x3] %vm2015_vm13, %v2012_v47 }
0x1c3a   :  { %2442 = shalt.err (!%p2439_p5)
}
0x1c3b   :  { %2026 = dma.vmem_to_hbm [thread:$0]  %s2024_s6, 32, %s3114_s3, [#allocation4]  }
0x1c3c   :  { %2455 = dma.done.wait [#allocation4], 32  }
0x1c3d   :  { %2456 = vsyncadd [#allocation4], 4294967264 }
0x1c3e   :  { %2030 = vsyncpa [#allocation3], 1 }
0x1c3f   :  { %2031 = vsyncpa [#allocation6], 1 }
0x1c40   :  { %2032 = vsyncpa [#allocation4], 1 }

</bundles_post_ra>
